<compile_context>
chip_gen: v7x
topology: tpu7x:2x2x1
jax: 0.10.0
libtpu: 0.0.40
codegen_flags: <defaults>
</compile_context>

<pallas_src>
import jax
import jax.numpy as jnp
from jax import lax
from jax.experimental import pallas as pl
from jax.experimental.pallas import tpu as pltpu


def _self_attention_kernel(gamma_ref,            # SMEM (1,)
                           xq_ref,               # VMEM (C, TQ) f32  query tile of x
                           xkv_ref,              # VMEM (C, TK) f32  key/value tile of x
                           wq_ref, bq_ref,       # VMEM (C, C) bf16, (C, 1) f32
                           wkv_ref, bkv_ref,     # VMEM (2C, C) bf16, (2C, 1) f32
                           o_ref,                # VMEM (C, TQ) f32
                           q_scr,                # VMEM (TQ, C) bf16
                           m_scr, l_scr,         # VMEM (TQ, 1) f32
                           acc_scr):             # VMEM (TQ, C) f32
    C = xq_ref.shape[0]
    kv = pl.program_id(2)

    @pl.when(kv == 0)
    def _init():
        # Q projection for this query tile, computed once and cached.
        xq_bf = xq_ref[...].astype(jnp.bfloat16)
        q = jnp.dot(wq_ref[...], xq_bf, preferred_element_type=jnp.float32)
        q = q + bq_ref[...]                                   # (C, TQ)
        q_scr[...] = jnp.transpose(q).astype(jnp.bfloat16)    # (TQ, C)
        m_scr[...] = jnp.full(m_scr.shape, -jnp.inf, dtype=m_scr.dtype)
        l_scr[...] = jnp.zeros(l_scr.shape, dtype=l_scr.dtype)
        acc_scr[...] = jnp.zeros(acc_scr.shape, dtype=acc_scr.dtype)

    # Fused K|V projection for this kv tile: one MXU pass, then slice.
    xkv_bf = xkv_ref[...].astype(jnp.bfloat16)
    kvp = jnp.dot(wkv_ref[...], xkv_bf, preferred_element_type=jnp.float32)
    kvp = kvp + bkv_ref[...]                                  # (2C, TK)
    k = kvp[:C, :].astype(jnp.bfloat16)                       # (C, TK)
    v = kvp[C:, :].astype(jnp.bfloat16)                       # (C, TK)

    # energy[qi, j] = sum_c q[c, qi] * k[c, j]
    e = jnp.dot(q_scr[...], k, preferred_element_type=jnp.float32)   # (TQ, TK)

    # Online softmax over the key axis.
    m_prev = m_scr[...]
    m_new = jnp.maximum(m_prev, jnp.max(e, axis=-1, keepdims=True))  # (TQ, 1)
    alpha = jnp.exp(m_prev - m_new)
    p = jnp.exp(e - m_new)                                           # (TQ, TK)
    l_scr[...] = alpha * l_scr[...] + jnp.sum(p, axis=-1, keepdims=True)
    # acc[qi, c] += sum_j p[qi, j] * v[c, j]
    acc_scr[...] = alpha * acc_scr[...] + lax.dot_general(
        p.astype(jnp.bfloat16), v, (((1,), (1,)), ((), ())),
        preferred_element_type=jnp.float32)
    m_scr[...] = m_new

    @pl.when(kv == pl.num_programs(2) - 1)
    def _finalize():
        out_t = acc_scr[...] * pl.reciprocal(l_scr[...], approx=True)  # (TQ, C)
        gamma = gamma_ref[0]
        o_ref[...] = (gamma * jnp.transpose(out_t)
                      + xq_ref[...]).astype(o_ref.dtype)               # (C, TQ)


def _pick_tile(n, requested):
    if requested is not None:
        return requested
    for cand in (512, 256, 128):
        if n % cand == 0:
            return cand
    # TODO(synk): pad ragged N (H*W not a multiple of 128) instead of falling
    # back to a single monolithic tile.
    return n


def self_attention(x_nchw, wq, bq, wk, bk, wv, bv, gamma, *, tq=None, tk=None):
    """x_nchw: (B, C, H, W) float32. Conv weights (C_out, C_in) (1x1 kernels
    squeezed), biases (C,), gamma scalar-shaped (1,)."""
    B, C, H, W = x_nchw.shape
    N = H * W
    tq = _pick_tile(N, tq)
    tk = _pick_tile(N, tk)
    nq, nk = N // tq, N // tk

    # Native NCHW flattening -- no transposes in the wrapper.
    x_cn = x_nchw.reshape(B, C, N)

    wq_bf = wq.astype(jnp.bfloat16)                              # (C, C)
    wkv_bf = jnp.concatenate([wk, wv], axis=0).astype(jnp.bfloat16)   # (2C, C)
    bq2 = bq.reshape(C, 1).astype(jnp.float32)
    bkv2 = jnp.concatenate([bk, bv], axis=0).reshape(2 * C, 1).astype(jnp.float32)
    gamma1 = gamma.reshape(1).astype(jnp.float32)

    wmap = lambda b, qi, ki: (0, 0)

    out_cn = pl.pallas_call(
        _self_attention_kernel,
        out_shape=jax.ShapeDtypeStruct((B, C, N), x_nchw.dtype),
        grid=(B, nq, nk),
        in_specs=[
            pl.BlockSpec(memory_space=pltpu.MemorySpace.SMEM),           # gamma
            pl.BlockSpec((None, C, tq), lambda b, qi, ki: (b, 0, qi)),   # x (query tile)
            pl.BlockSpec((None, C, tk), lambda b, qi, ki: (b, 0, ki)),   # x (kv tile)
            pl.BlockSpec((C, C), wmap), pl.BlockSpec((C, 1), wmap),      # Wq, bq
            pl.BlockSpec((2 * C, C), wmap), pl.BlockSpec((2 * C, 1), wmap),  # Wkv, bkv
        ],
        out_specs=pl.BlockSpec((None, C, tq), lambda b, qi, ki: (b, 0, qi)),
        scratch_shapes=[
            pltpu.VMEM((tq, C), jnp.bfloat16),   # cached projected Q tile
            pltpu.VMEM((tq, 1), jnp.float32),    # running max
            pltpu.VMEM((tq, 1), jnp.float32),    # running sum
            pltpu.VMEM((tq, C), jnp.float32),    # output accumulator
        ],
        compiler_params=pltpu.CompilerParams(
            dimension_semantics=("parallel", "parallel", "arbitrary")),
    )(gamma1, x_cn, x_cn, wq_bf, bq2, wkv_bf, bkv2)

    return out_cn.reshape(B, C, H, W)


def self_attention_ref(x_nchw, wq, bq, wk, bk, wv, bv, gamma):
    """Pure-JAX f32 reference mirroring the PyTorch forward exactly."""
    B, C, H, W = x_nchw.shape
    N = H * W
    xf = x_nchw.reshape(B, C, N)                        # (B, C, N)
    conv = lambda w, b: jnp.einsum("oc,bcn->bon", w, xf) + b[None, :, None]
    q = conv(wq, bq)                                    # (B, C, N)
    k = conv(wk, bk)
    v = conv(wv, bv)
    proj_query = jnp.transpose(q, (0, 2, 1))            # (B, N, C)
    energy = jnp.einsum("bnc,bcm->bnm", proj_query, k)  # (B, N, N)
    attention = jax.nn.softmax(energy, axis=-1)
    out = jnp.einsum("bcn,bmn->bcm", v, attention)      # proj_value.bmm(attn^T)
    out = out.reshape(B, C, H, W)
    return gamma.reshape(()) * out + x_nchw


if __name__ == "__main__":
    B, C, H, W = 2, 32, 16, 16          # N = 256 -> 2 query tiles x 2 kv tiles
    key = jax.random.PRNGKey(0)
    kx, kq, kk, kv, kbq, kbk, kbv = jax.random.split(key, 7)

    x = jax.random.normal(kx, (B, C, H, W), dtype=jnp.float32)

    # Deterministic parameter init (nn.Conv2d(C, C, 1): weight (C, C, 1, 1), bias (C,))
    scale = 1.0 / jnp.sqrt(jnp.float32(C))
    wq = jax.random.uniform(kq, (C, C), jnp.float32, -scale, scale)
    wk = jax.random.uniform(kk, (C, C), jnp.float32, -scale, scale)
    wv = jax.random.uniform(kv, (C, C), jnp.float32, -scale, scale)
    bq = jax.random.uniform(kbq, (C,), jnp.float32, -scale, scale)
    bk = jax.random.uniform(kbk, (C,), jnp.float32, -scale, scale)
    bv = jax.random.uniform(kbv, (C,), jnp.float32, -scale, scale)
    # nn.Parameter(torch.zeros(1)) -> gamma init is 0; use a nonzero value so
    # the attention path actually contributes under test.
    gamma = jnp.array([0.5], dtype=jnp.float32)

    out = self_attention(x, wq, bq, wk, bk, wv, bv, gamma, tq=128, tk=128)
    out = jax.block_until_ready(out)

    ref = self_attention_ref(x, wq, bq, wk, bk, wv, bv, gamma)
    assert out.shape == (B, C, H, W)
    # bf16 MXU matmuls (f32 accumulation) -> validate at a bf16-appropriate tolerance.
    max_err = float(jnp.max(jnp.abs(out - ref)))
    assert jnp.allclose(out, ref, atol=2e-2, rtol=2e-2), max_err

    print("KERNEL_OK")
</pallas_src>

<mosaic_0001>
module attributes {stable_mosaic.version = 11 : i64} {
  func.func @_self_attention_kernel(%arg0: i32, %arg1: i32, %arg2: i32, %arg3: memref<1xf32, #tpu.memory_space<smem>>, %arg4: memref<1x32x128xf32, #tpu.memory_space<vmem>>, %arg5: memref<1x32x128xf32, #tpu.memory_space<vmem>>, %arg6: memref<32x32xbf16, #tpu.memory_space<vmem>>, %arg7: memref<32x1xf32, #tpu.memory_space<vmem>>, %arg8: memref<64x32xbf16, #tpu.memory_space<vmem>>, %arg9: memref<64x1xf32, #tpu.memory_space<vmem>>, %arg10: memref<1x32x128xf32, #tpu.memory_space<vmem>>, %arg11: memref<128x32xbf16, #tpu.memory_space<vmem>>, %arg12: memref<128x1xf32, #tpu.memory_space<vmem>>, %arg13: memref<128x1xf32, #tpu.memory_space<vmem>>, %arg14: memref<128x32xf32, #tpu.memory_space<vmem>>) attributes {dimension_semantics = [#tpu.dimension_semantics<parallel>, #tpu.dimension_semantics<parallel>, #tpu.dimension_semantics<arbitrary>], iteration_bounds = array<i64: 2, 2, 2>, scalar_prefetch = 0 : i64, scratch_operands = 4 : i64, tpu.core_type = #tpu.core_type<tc>, window_params = [{transform_indices = @transform_0, window_bounds = array<i64: 1>}, {transform_indices = @transform_1, window_bounds = array<i64: 1, 32, 128>}, {transform_indices = @transform_2, window_bounds = array<i64: 1, 32, 128>}, {pipeline_mode = #tpu.pipeline_mode<synchronous>, transform_indices = @transform_3, window_bounds = array<i64: 32, 32>}, {pipeline_mode = #tpu.pipeline_mode<synchronous>, transform_indices = @transform_4, window_bounds = array<i64: 32, 1>}, {pipeline_mode = #tpu.pipeline_mode<synchronous>, transform_indices = @transform_5, window_bounds = array<i64: 64, 32>}, {pipeline_mode = #tpu.pipeline_mode<synchronous>, transform_indices = @transform_6, window_bounds = array<i64: 64, 1>}, {transform_indices = @transform_7, window_bounds = array<i64: 1, 32, 128>}]} {
    %c0_i32 = arith.constant 0 : i32
    %0 = arith.cmpi eq, %arg2, %c0_i32 : i32
    %1 = arith.extui %0 : i1 to i32
    %c0_i32_0 = arith.constant 0 : i32
    %2 = arith.cmpi ne, %1, %c0_i32_0 : i32
    scf.if %2 {
      %c0_26 = arith.constant 0 : index
      %c0_27 = arith.constant 0 : index
      %c0_28 = arith.constant 0 : index
      %43 = vector.load %arg4[%c0_26, %c0_27, %c0_28] : memref<1x32x128xf32, #tpu.memory_space<vmem>>, vector<1x32x128xf32>
      %44 = vector.shape_cast %43 : vector<1x32x128xf32> to vector<32x128xf32>
      %45 = arith.truncf %44 : vector<32x128xf32> to vector<32x128xbf16>
      %c0_29 = arith.constant 0 : index
      %c0_30 = arith.constant 0 : index
      %46 = vector.load %arg6[%c0_29, %c0_30] : memref<32x32xbf16, #tpu.memory_space<vmem>>, vector<32x32xbf16>
      %cst_31 = arith.constant dense<0.000000e+00> : vector<32x128xf32>
      %47 = tpu.matmul %46, %45, %cst_31 {dimension_numbers = #tpu.dot_dimension_numbers<[1], [0], [0], [1], [0, 0, 1, 1], [], []>} : vector<32x32xbf16>, vector<32x128xbf16>, vector<32x128xf32> -> vector<32x128xf32>
      %c0_32 = arith.constant 0 : index
      %c0_33 = arith.constant 0 : index
      %48 = vector.load %arg7[%c0_32, %c0_33] : memref<32x1xf32, #tpu.memory_space<vmem>>, vector<32x1xf32>
      %49 = vector.broadcast %48 : vector<32x1xf32> to vector<32x128xf32>
      %50 = arith.addf %47, %49 : vector<32x128xf32>
      %51 = tpu.transpose %50, [1, 0] : vector<32x128xf32> -> vector<128x32xf32>
      %52 = arith.truncf %51 : vector<128x32xf32> to vector<128x32xbf16>
      %c0_34 = arith.constant 0 : index
      %c0_35 = arith.constant 0 : index
      %53 = vector.load %arg11[%c0_34, %c0_35] : memref<128x32xbf16, #tpu.memory_space<vmem>>, vector<128x32xbf16>
      tpu.vector_store %arg11[%c0_34, %c0_35], %52 {strides = array<i32>} : memref<128x32xbf16, #tpu.memory_space<vmem>>, vector<128x32xbf16>,
      %cst_36 = arith.constant 0xFF800000 : f32
      %54 = vector.broadcast %cst_36 : f32 to vector<128x1xf32>
      %c0_37 = arith.constant 0 : index
      %c0_38 = arith.constant 0 : index
      %55 = vector.load %arg12[%c0_37, %c0_38] : memref<128x1xf32, #tpu.memory_space<vmem>>, vector<128x1xf32>
      tpu.vector_store %arg12[%c0_37, %c0_38], %54 {strides = array<i32>} : memref<128x1xf32, #tpu.memory_space<vmem>>, vector<128x1xf32>,
      %cst_39 = arith.constant 0.000000e+00 : f32
      %56 = vector.broadcast %cst_39 : f32 to vector<128x1xf32>
      %c0_40 = arith.constant 0 : index
      %c0_41 = arith.constant 0 : index
      %57 = vector.load %arg13[%c0_40, %c0_41] : memref<128x1xf32, #tpu.memory_space<vmem>>, vector<128x1xf32>
      tpu.vector_store %arg13[%c0_40, %c0_41], %56 {strides = array<i32>} : memref<128x1xf32, #tpu.memory_space<vmem>>, vector<128x1xf32>,
      %cst_42 = arith.constant 0.000000e+00 : f32
      %58 = vector.broadcast %cst_42 : f32 to vector<128x32xf32>
      %c0_43 = arith.constant 0 : index
      %c0_44 = arith.constant 0 : index
      %59 = vector.load %arg14[%c0_43, %c0_44] : memref<128x32xf32, #tpu.memory_space<vmem>>, vector<128x32xf32>
      tpu.vector_store %arg14[%c0_43, %c0_44], %58 {strides = array<i32>} : memref<128x32xf32, #tpu.memory_space<vmem>>, vector<128x32xf32>,
    } else {
    }
    %c0 = arith.constant 0 : index
    %c0_1 = arith.constant 0 : index
    %c0_2 = arith.constant 0 : index
    %3 = vector.load %arg5[%c0, %c0_1, %c0_2] : memref<1x32x128xf32, #tpu.memory_space<vmem>>, vector<1x32x128xf32>
    %4 = vector.shape_cast %3 : vector<1x32x128xf32> to vector<32x128xf32>
    %5 = arith.truncf %4 : vector<32x128xf32> to vector<32x128xbf16>
    %c0_3 = arith.constant 0 : index
    %c0_4 = arith.constant 0 : index
    %6 = vector.load %arg8[%c0_3, %c0_4] : memref<64x32xbf16, #tpu.memory_space<vmem>>, vector<64x32xbf16>
    %cst = arith.constant dense<0.000000e+00> : vector<64x128xf32>
    %7 = tpu.matmul %6, %5, %cst {dimension_numbers = #tpu.dot_dimension_numbers<[1], [0], [0], [1], [0, 0, 1, 1], [], []>} : vector<64x32xbf16>, vector<32x128xbf16>, vector<64x128xf32> -> vector<64x128xf32>
    %c0_5 = arith.constant 0 : index
    %c0_6 = arith.constant 0 : index
    %8 = vector.load %arg9[%c0_5, %c0_6] : memref<64x1xf32, #tpu.memory_space<vmem>>, vector<64x1xf32>
    %9 = vector.broadcast %8 : vector<64x1xf32> to vector<64x128xf32>
    %10 = arith.addf %7, %9 : vector<64x128xf32>
    %11 = vector.extract_strided_slice %10 {offsets = [0, 0], sizes = [32, 128], strides = [1, 1]} : vector<64x128xf32> to vector<32x128xf32>
    %12 = arith.truncf %11 : vector<32x128xf32> to vector<32x128xbf16>
    %13 = vector.extract_strided_slice %10 {offsets = [32, 0], sizes = [32, 128], strides = [1, 1]} : vector<64x128xf32> to vector<32x128xf32>
    %14 = arith.truncf %13 : vector<32x128xf32> to vector<32x128xbf16>
    %c0_7 = arith.constant 0 : index
    %c0_8 = arith.constant 0 : index
    %15 = vector.load %arg11[%c0_7, %c0_8] : memref<128x32xbf16, #tpu.memory_space<vmem>>, vector<128x32xbf16>
    %cst_9 = arith.constant dense<0.000000e+00> : vector<128x128xf32>
    %16 = tpu.matmul %15, %12, %cst_9 {dimension_numbers = #tpu.dot_dimension_numbers<[1], [0], [0], [1], [0, 0, 1, 1], [], []>} : vector<128x32xbf16>, vector<32x128xbf16>, vector<128x128xf32> -> vector<128x128xf32>
    %c0_10 = arith.constant 0 : index
    %c0_11 = arith.constant 0 : index
    %17 = vector.load %arg12[%c0_10, %c0_11] : memref<128x1xf32, #tpu.memory_space<vmem>>, vector<128x1xf32>
    %cst_12 = arith.constant dense<0xFF800000> : vector<128xf32>
    %18 = vector.multi_reduction <maximumf>, %16, %cst_12 [1] : vector<128x128xf32> to vector<128xf32>
    %19 = vector.shape_cast %18 : vector<128xf32> to vector<128x1xf32>
    %20 = arith.maximumf %17, %19 : vector<128x1xf32>
    %21 = arith.subf %17, %20 : vector<128x1xf32>
    %22 = math.exp %21 : vector<128x1xf32>
    %23 = vector.broadcast %20 : vector<128x1xf32> to vector<128x128xf32>
    %24 = arith.subf %16, %23 : vector<128x128xf32>
    %25 = math.exp %24 : vector<128x128xf32>
    %c0_13 = arith.constant 0 : index
    %c0_14 = arith.constant 0 : index
    %26 = vector.load %arg13[%c0_13, %c0_14] : memref<128x1xf32, #tpu.memory_space<vmem>>, vector<128x1xf32>
    %27 = arith.mulf %22, %26 : vector<128x1xf32>
    %cst_15 = arith.constant dense<0.000000e+00> : vector<128xf32>
    %28 = vector.multi_reduction <add>, %25, %cst_15 [1] : vector<128x128xf32> to vector<128xf32>
    %29 = vector.shape_cast %28 : vector<128xf32> to vector<128x1xf32>
    %30 = arith.addf %27, %29 : vector<128x1xf32>
    %c0_16 = arith.constant 0 : index
    %c0_17 = arith.constant 0 : index
    %31 = vector.load %arg13[%c0_16, %c0_17] : memref<128x1xf32, #tpu.memory_space<vmem>>, vector<128x1xf32>
    tpu.vector_store %arg13[%c0_16, %c0_17], %30 {strides = array<i32>} : memref<128x1xf32, #tpu.memory_space<vmem>>, vector<128x1xf32>,
    %c0_18 = arith.constant 0 : index
    %c0_19 = arith.constant 0 : index
    %32 = vector.load %arg14[%c0_18, %c0_19] : memref<128x32xf32, #tpu.memory_space<vmem>>, vector<128x32xf32>
    %33 = vector.broadcast %22 : vector<128x1xf32> to vector<128x32xf32>
    %34 = arith.mulf %33, %32 : vector<128x32xf32>
    %35 = arith.truncf %25 : vector<128x128xf32> to vector<128x128xbf16>
    %cst_20 = arith.constant dense<0.000000e+00> : vector<128x32xf32>
    %36 = tpu.matmul %35, %14, %cst_20 {dimension_numbers = #tpu.dot_dimension_numbers<[1], [1], [0], [0], [0, 0, 1, 0], [], []>} : vector<128x128xbf16>, vector<32x128xbf16>, vector<128x32xf32> -> vector<128x32xf32>
    %37 = arith.addf %34, %36 : vector<128x32xf32>
    %c0_21 = arith.constant 0 : index
    %c0_22 = arith.constant 0 : index
    %38 = vector.load %arg14[%c0_21, %c0_22] : memref<128x32xf32, #tpu.memory_space<vmem>>, vector<128x32xf32>
    tpu.vector_store %arg14[%c0_21, %c0_22], %37 {strides = array<i32>} : memref<128x32xf32, #tpu.memory_space<vmem>>, vector<128x32xf32>,
    %c0_23 = arith.constant 0 : index
    %c0_24 = arith.constant 0 : index
    %39 = vector.load %arg12[%c0_23, %c0_24] : memref<128x1xf32, #tpu.memory_space<vmem>>, vector<128x1xf32>
    tpu.vector_store %arg12[%c0_23, %c0_24], %20 {strides = array<i32>} : memref<128x1xf32, #tpu.memory_space<vmem>>, vector<128x1xf32>,
    %c1_i32 = arith.constant 1 : i32
    %40 = arith.cmpi eq, %arg2, %c1_i32 : i32
    %41 = arith.extui %40 : i1 to i32
    %c0_i32_25 = arith.constant 0 : i32
    %42 = arith.cmpi ne, %41, %c0_i32_25 : i32
    scf.if %42 {
      %c0_26 = arith.constant 0 : index
      %c0_27 = arith.constant 0 : index
      %43 = vector.load %arg14[%c0_26, %c0_27] : memref<128x32xf32, #tpu.memory_space<vmem>>, vector<128x32xf32>
      %c0_28 = arith.constant 0 : index
      %c0_29 = arith.constant 0 : index
      %44 = vector.load %arg13[%c0_28, %c0_29] : memref<128x1xf32, #tpu.memory_space<vmem>>, vector<128x1xf32>
      %45 = tpu.reciprocal %44 {approx = true} : vector<128x1xf32> -> vector<128x1xf32>
      %46 = vector.broadcast %45 : vector<128x1xf32> to vector<128x32xf32>
      %47 = arith.mulf %43, %46 : vector<128x32xf32>
      %c0_30 = arith.constant 0 : index
      %48 = memref.load %arg3[%c0_30] : memref<1xf32, #tpu.memory_space<smem>>
      %49 = tpu.transpose %47, [1, 0] : vector<128x32xf32> -> vector<32x128xf32>
      %50 = vector.broadcast %48 : f32 to vector<32x128xf32>
      %51 = arith.mulf %50, %49 : vector<32x128xf32>
      %c0_31 = arith.constant 0 : index
      %c0_32 = arith.constant 0 : index
      %c0_33 = arith.constant 0 : index
      %52 = vector.load %arg4[%c0_31, %c0_32, %c0_33] : memref<1x32x128xf32, #tpu.memory_space<vmem>>, vector<1x32x128xf32>
      %53 = vector.shape_cast %52 : vector<1x32x128xf32> to vector<32x128xf32>
      %54 = arith.addf %51, %53 : vector<32x128xf32>
      %c0_34 = arith.constant 0 : index
      %c0_35 = arith.constant 0 : index
      %c0_36 = arith.constant 0 : index
      %55 = vector.load %arg10[%c0_34, %c0_35, %c0_36] : memref<1x32x128xf32, #tpu.memory_space<vmem>>, vector<1x32x128xf32>
      %56 = vector.shape_cast %55 : vector<1x32x128xf32> to vector<32x128xf32>
      %57 = vector.shape_cast %54 : vector<32x128xf32> to vector<1x32x128xf32>
      tpu.vector_store %arg10[%c0_34, %c0_35, %c0_36], %57 {strides = array<i32>} : memref<1x32x128xf32, #tpu.memory_space<vmem>>, vector<1x32x128xf32>,
    } else {
    }
    return
  }
  func.func @transform_0(%arg0: i32, %arg1: i32, %arg2: i32) -> i32 {
    %c0_i32 = arith.constant 0 : i32
    %c0_i32_0 = arith.constant 0 : i32
    return %c0_i32 : i32
  }
  func.func @transform_1(%arg0: i32, %arg1: i32, %arg2: i32) -> (i32, i32, i32) {
    %c0_i32 = arith.constant 0 : i32
    %c0_i32_0 = arith.constant 0 : i32
    return %arg0, %c0_i32, %arg1 : i32, i32, i32
  }
  func.func @transform_2(%arg0: i32, %arg1: i32, %arg2: i32) -> (i32, i32, i32) {
    %c0_i32 = arith.constant 0 : i32
    %c0_i32_0 = arith.constant 0 : i32
    return %arg0, %c0_i32, %arg2 : i32, i32, i32
  }
  func.func @transform_3(%arg0: i32, %arg1: i32, %arg2: i32) -> (i32, i32) {
    %c0_i32 = arith.constant 0 : i32
    %c0_i32_0 = arith.constant 0 : i32
    %c0_i32_1 = arith.constant 0 : i32
    return %c0_i32, %c0_i32_0 : i32, i32
  }
  func.func @transform_4(%arg0: i32, %arg1: i32, %arg2: i32) -> (i32, i32) {
    %c0_i32 = arith.constant 0 : i32
    %c0_i32_0 = arith.constant 0 : i32
    %c0_i32_1 = arith.constant 0 : i32
    return %c0_i32, %c0_i32_0 : i32, i32
  }
  func.func @transform_5(%arg0: i32, %arg1: i32, %arg2: i32) -> (i32, i32) {
    %c0_i32 = arith.constant 0 : i32
    %c0_i32_0 = arith.constant 0 : i32
    %c0_i32_1 = arith.constant 0 : i32
    return %c0_i32, %c0_i32_0 : i32, i32
  }
  func.func @transform_6(%arg0: i32, %arg1: i32, %arg2: i32) -> (i32, i32) {
    %c0_i32 = arith.constant 0 : i32
    %c0_i32_0 = arith.constant 0 : i32
    %c0_i32_1 = arith.constant 0 : i32
    return %c0_i32, %c0_i32_0 : i32, i32
  }
  func.func @transform_7(%arg0: i32, %arg1: i32, %arg2: i32) -> (i32, i32, i32) {
    %c0_i32 = arith.constant 0 : i32
    %c0_i32_0 = arith.constant 0 : i32
    return %arg0, %c0_i32, %arg1 : i32, i32, i32
  }
}

</mosaic_0001>

<bundles_post_ra>
// kernel: tpu_custom_call.1
= control target key start
LH: loop header
LB: loop body
LE: loop exit
PB: predicated region body
PF: predicated region fallthrough
CT: control target
= control target key end

     0   :  { %s3271_s0 = inlined_call_operand.<no memory space> [shape: f32[1], index: 0, kind: input, shape index: {}]   ;;  %s3272_s1 = inlined_call_operand.vmem [shape: f32[2,32,256], index: 1, kind: input, shape index: {}]   ;;  %s3273_s2 = inlined_call_operand.hbm [shape: f32[2,32,256], index: 2, kind: input, shape index: {}]   ;;  %s3274_s3 = inlined_call_operand.hbm [shape: bf16[32,32], index: 3, kind: input, shape index: {}]   ;;  %s3275_s4 = inlined_call_operand.vmem [shape: f32[32,1], index: 4, kind: input, shape index: {}]   ;;  %s3276_s5 = inlined_call_operand.vmem [shape: bf16[64,32], index: 5, kind: input, shape index: {}]   ;;  %s3277_s6 = inlined_call_operand.vmem [shape: f32[64,1], index: 6, kind: input, shape index: {}]   ;;  %s3278_s7 = inlined_call_operand.hbm [shape: f32[2,32,256], index: 7, kind: output, shape index: {}]  }
   0x1   :  { %3295 = sst [smem:[#allocation27_spill]] %s3276_s5 }
   0x2   :  { %3296 = sst [smem:[#allocation28_spill]] %s3277_s6 }
   0x3   :  { %3297 = sst [smem:[#allocation29_spill]] %s3278_s7 }
   0x4   :  { %12 = sst [smem:[#allocation6]] %s3271_s0 }
   0x5   :  { %13 = vsyncpa [#allocation9], 0 }
   0x6   :  { %15 = vsyncpa [#allocation9 + $0x1], 0 }
   0x7   :  { %16 = vsyncpa [#allocation12], 0 }
   0x8   :  { %17 = vsyncpa [#allocation10], 0 }
   0x9   :  { %19 = vsyncpa [#allocation10 + $0x1], 0  ;;  %s2482_s26 = smov 0   ;;  %s2484_s27 = smov 0  }
   0xa   :  { %s2486_s28 = smov 0   ;;  %s2488_s29 = smov 0  }
   0xb   :  { %s2490_s30 = smov 0   ;;  %s2492_s8 = smov 0  }
   0xc   :  { %s2494_s9 = smov 0   ;;  %s2496_s0 = smov 0  }
   0xd   :  { %s2498_s10 = smov 0   ;;  %s2500_s11 = smov 0  }
   0xe   :  { %s2502_s12 = smov 0   ;;  %s2504_s13 = smov 0  }
   0xf   :  { %s2506_s14 = smov 0  }
  0x10 LB: > { %3298 = sst [smem:[#allocation17_spill]] %s2373_s26  ;;  %s1841_s15 = sadd.s32 4294967295, %s2421_s14   ;;  %s2421_s14 = sphi %s2506_s14, %s25_s14   ;;  %s2417_s13 = sphi %s2504_s13, %s3352_s13   ;;  %s2413_s12 = sphi %s2502_s12, %s3351_s12   ;;  %s2409_s11 = sphi %s2500_s11, %s3350_s11   ;;  %s2405_s10 = sphi %s2498_s10, %s3349_s10   ;;  %s2401_s0 = sphi %s2496_s0, %s3348_s0   ;;  %s2397_s9 = sphi %s2494_s9, %s3347_s9   ;;  %s2393_s8 = sphi %s2492_s8, %s3346_s8   ;;  %s2389_s30 = sphi %s2490_s30, %s3345_s30   ;;  %s2385_s29 = sphi %s2488_s29, %s3344_s29   ;;  %s2381_s28 = sphi %s2486_s28, %s3343_s28   ;;  %s2377_s27 = sphi %s2484_s27, %s3342_s27   ;;  %s2373_s26 = sphi %s2482_s26, %s3341_s26  }
  0x11   : > { %3299 = sst [smem:[#allocation18_spill]] %s2401_s0  ;;  %s37_s17 = sadd.s32 1, %s2409_s11 }
  0x12   : > { %3300 = sst [smem:[#allocation19_spill]] %s2405_s10  ;;  %s40_s18 = sadd.s32 1, %s2413_s12 }
  0x13   : > { %p38_p0 = scmp.ge.s32.totalorder %s37_s17, 2  ;;  %s44_s19 = sadd.s32 1, %s2417_s13 }
  0x14   : > { %p81_p1 = scmp.ne.s32.totalorder %s2393_s8, %s2389_s30  ;;  %p82_p2 = scmp.eq.s32.totalorder %s2421_s14, 0 }
  0x15   : > { %s3354_s17 = smov (%p38_p0, %s37_s17), 0  ;;  %s3356_s18 = smov (!%p38_p0, %s40_s18), %s2413_s12 }
  0x16   : > { %3301 = sst [smem:[#allocation20_spill]] %s3354_s17  ;;  %s98_s21 = ssub.s32 %s2409_s11, %s3354_s17 }
  0x17   : > { %p42_p3 = scmp.ge.s32.totalorder %s3356_s18, 2  ;;  %s102_s22 = sadd.s32 1, %s2385_s29 }
  0x18   : > { %p2565_p4 = por %p82_p2, %p81_p1  ;;  %p109_p5 = scmp.ne.s32.totalorder %s2385_s29, %s2381_s28 }
  0x19   : > { %s3358_s18 = smov (%p42_p3, %s3356_s18), 0  ;;  %s3360_s19 = smov (!%p42_p3, %s44_s19), %s2417_s13 }
  0x1a   : > { %s3302_s23 = scalar_select %p2565_p4, 1, 0 }
  0x1b   : > { %3303 = sst [smem:[#allocation21_spill]] %s3358_s18  ;;  %s70_s24 = ssub.s32 %s2413_s12, %s3358_s18 }
  0x1c   : > { %p2576_p6 = por %p109_p5, %p82_p2  ;;  %p46_p7 = scmp.ge.s32.totalorder %s3360_s19, 2 }
  0x1d   : > { %p115_p8 = scmp.ne.s32.totalorder %s2381_s28, %s2377_s27  ;;  %p2582_p9 = scmp.eq.s32.totalorder %s1841_s15, 0 }
  0x1e   : > { %s3304_s25 = scalar_select %p2576_p6, 1, 0 }
  0x1f   : > { %s3305_s20 = scalar_select %p2582_p9, 1, 0 }
  0x20   : > { %p225_p10 = scmp.eq.s32.totalorder %s1841_s15, 7  ;;  %s3362_s19 = smov (%p46_p7, %s3360_s19), 0 }
  0x21   : > { %3306 = sst [smem:[#allocation22_spill]] %s3362_s19  ;;  %p2590_p11 = por %p2582_p9, %p115_p8 }
  0x22   : > { %p2597_p12 = por %p225_p10, %p81_p1  ;;  %s69_s27 = ssub.s32 %s2417_s13, %s3362_s19 }
  0x23   : > { %s3307_s16 = scalar_select %p2590_p11, 1, 0 }
  0x24   : > { %s3308_s18 = scalar_select %p2597_p12, 1, 0 }
  0x25   : > { %p230_p13 = scmp.ne.s32.totalorder %s2389_s30, %s2373_s26  ;;  %s71_s17 = sor.u32 %s70_s24, %s69_s27 }
  0x26   : > { %3309 = sst [smem:[#allocation23_spill]] %s3308_s18  ;;  %s99_s7 = sor.u32 %s98_s21, %s69_s27 }
  0x27   : > { %p72_p0 = scmp.eq.s32.totalorder %s71_s17, 0  ;;  %p100_p2 = scmp.eq.s32.totalorder %s99_s7, 0 }
  0x28   : > { %s3310_s15 = sadd.s32 4294967294, %s2421_s14   ;;  %p1843_p5 = scmp.ge.s32.totalorder %s2421_s14, 1 }
  0x29   : > { %p231_p3 = scmp.eq.s32.totalorder %s3310_s15, 7  ;;  %s3311_s0 = sadd.s32 1, %s2393_s8 }
  0x2a   : > { %s2611_s10 = scalar_select %p72_p0, %s2393_s8, %s3311_s0  }
  0x2b   : > { %s2614_s6 = scalar_select %p100_p2, %s2385_s29, %s102_s22  }
  0x2c   : > { %3312 = sst [smem:[#allocation24_spill]] %s2611_s10  ;;  %p2616_p7 = por %p231_p3, %p230_p13 }
  0x2d   : > { %3313 = sst [smem:[#allocation25_spill]] %s2614_s6  ;;  %p238_p1 = scmp.lt.s32.totalorder %s2421_s14, 9 }
  0x2e   : > { %s3314_s5 = scalar_select %p2616_p7, 1, 0 }
  0x2f   : > { %p2621_p8 = pnand %p1843_p5, %p238_p1  ;;  %s2423_s17 = smov [#allocation11]  }
  0x30   : > { %3315 = sst [smem:[#allocation26_spill]] %s3314_s5  ;;  %s253_s7 = sshll.u32 %s2423_s17, 4  ;;  %s254_s7 = int_to_ptr.vmem [resolvable:$true] %s253_s7 }
  0x31   : > { %s3316_s19 = scalar_select %p2621_p8, 1, 0 }
  0x32   : > { %p1986_p10 = pneg %p2621_p8  ;;  %s2223_s24 = scalar_lea.hbm %s3274_s3, 256 }
  0x33   : > { %p2224_p13 = scmp.ne.s32.totalorder %s3274_s3, %s2223_s24  ;;  %p2230_p1 = scmp.lt.u32.totalorder %s2223_s24, %s3274_s3 }
  0x34   : > { %p2629_p0 = pnand %p1986_p10, %p2582_p9 }
  0x36   : > { %p2225_p2 = pneg %p2629_p0 }
  0x38   : > { %p2226_p3 = pnand %p2225_p2, %p2224_p13 }
  0x3a   : > { %p2227_p5 = pneg %p2226_p3 }
  0x3c   : > { %p2232_p10 = pnand %p2230_p1, %p2227_p5 }
  0x3e   : > { %2235 = shalt.err (!%p2232_p10)
}
  0x3f   : > { %s2236_s6 = scalar_lea.vmem %s254_s7, 256  ;;  %p2244_p11 = scmp.lt.s32.totalorder %s254_s7, %s254_s7 }
  0x40   : > { %p2237_p7 = scmp.ne.s32.totalorder %s254_s7, %s2236_s6  ;;  %p2245_p8 = scmp.lt.s32.totalorder %s2236_s6, %s2236_s6 }
  0x42   : > { %p2239_p12 = pnand %p2237_p7, %p2225_p2  ;;  %p2246_p6 = por %p2245_p8, %p2244_p11 }
  0x44   : > { %p2240_p9 = pneg %p2239_p12 }
  0x46   : > { %p2247_p4 = pnand %p2246_p6, %p2240_p9 }
  0x48   : > { %2250 = shalt.err (!%p2247_p4)
}
  0x49   : > { %s2424_s21 = smov 64   ;;  %s2425_s22 = smov 4  }
  0x4a   : > { %1989 = dma.hbm_to_vmem [thread:$0]  (!%p2629_p0), %s3274_s3, 256, %s254_s7, [#allocation12], %s2424_s21, %s2424_s21, %s2425_s22  }
  0x4b   : > { %p1845_p13 = scmp.ge.s32.totalorder %s2421_s14, 8 }
  0x4c   : > { %p3318_p3 = scmp.ne.s32.totalorder (!%p1845_p13), %s3302_s23, 0 }
  0x4d   : > { %272 = sbr.rel (%p1845_p13) target bundleno = 121 (0x79), region = 36 }
  0x54   : > { %275 = sbr.rel (!%p3318_p3) target bundleno = 92 (0x5c), region = 40  ;;  %s277_s6 = sand.u32 (%p3318_p3), 1, %s2393_s8  }
  0x55   : > { %s1847_s10 = sshll.u32 (%p3318_p3), %s2417_s13, 3  ;;  %s1846_s24 = sshll.u32 (%p3318_p3), %s277_s6, 5 }
  0x56   : > { %s281_s17 = sadd.s32 (%p3318_p3), %s2413_s12, %s1847_s10  ;;  %s279_s7 = scalar_lea.vmem (%p3318_p3), [#allocation7], %s1846_s24 }
  0x57   : > { %s1848_s5 = sshll.u32 (%p3318_p3), %s281_s17, 3 }
  0x58   : > { %s283_s18 = scalar_lea.vmem (%p3318_p3), %s3272_s1, %s1848_s5 }
  0x59   : > { %v317_v0 = vld [vmem:[%s283_s18] sm:$0xff] (%p3318_p3)  ;;  %v319_v1 = vld [vmem:[%s283_s18 + $0x10] sm:$0xff] (%p3318_p3) }
  0x5a   : > { %v321_v2 = vld [vmem:[%s283_s18 + $0x20] sm:$0xff] (%p3318_p3)  ;;  %318 = vst [vmem:[%s279_s7] sm:$0xff] (%p3318_p3), %v317_v0  ;;  %320 = vst [vmem:[%s279_s7 + $0x8] sm:$0xff] (%p3318_p3), %v319_v1  ;;  %v323_v3 = vld [vmem:[%s283_s18 + $0x30] sm:$0xff] (%p3318_p3) }
  0x5b   : > { %322 = vst [vmem:[%s279_s7 + $0x10] sm:$0xff] %v321_v2  ;;  %324 = vst [vmem:[%s279_s7 + $0x18] sm:$0xff] %v323_v3 }
  0x5c PF: > { %s331_s23 = sand.u32 1, %s2385_s29   ;;  %s1850_s21 = sshll.u32 %s2417_s13, 3 }
  0x5d   : > { %s1849_s22 = sshll.u32 %s331_s23, 5  ;;  %s340_s27 = sadd.s32 %s2409_s11, %s1850_s21 }
  0x5e   : > { %s1851_s26 = sshll.u32 %s340_s27, 7  ;;  %s335_s5 = scalar_lea.vmem [#allocation8], %s1849_s22 }
  0x5f   : > { %s343_s15 = sshll.u32 %s335_s5, 4  ;;  %s2664_s24 = scalar_lea.hbm %s3273_s2, %s1851_s26  ;;  %s2666_s15 = int_to_ptr.vmem [resolvable:$true] %s343_s15 }
  0x60   : > { %s2668_s18 = scalar_lea.sflag [#allocation9], %s331_s23  ;;  %s2251_s17 = scalar_lea.hbm %s2664_s24, 512 }
  0x61   : > { %p2252_p4 = scmp.ne.s32.totalorder %s2664_s24, %s2251_s17  ;;  %p3319_p6 = scmp.ne.s32.totalorder %s3304_s25, 0 }
  0x62   : > { %s2255_s21 = scalar_lea.hbm %s3273_s2, 2048  ;;  %p2256_p12 = scmp.lt.u32.totalorder %s2664_s24, %s3273_s2 }
  0x63   : > { %p2253_p9 = pnand %p2252_p4, %p3319_p6  ;;  %p2257_p7 = scmp.lt.u32.totalorder %s2255_s21, %s2251_s17 }
  0x64   : > { %p2259_p0 = scmp.lt.u32.totalorder %s2251_s17, %s2664_s24 }
  0x65   : > { %p2254_p11 = pneg %p2253_p9  ;;  %p2258_p8 = por %p2257_p7, %p2256_p12 }
  0x67   : > { %p2260_p2 = por %p2259_p0, %p2258_p8 }
  0x69   : > { %p2261_p5 = pnand %p2260_p2, %p2254_p11 }
  0x6b   : > { %2264 = shalt.err (!%p2261_p5)
}
  0x6c   : > { %s2265_s23 = scalar_lea.vmem %s2666_s15, 512  ;;  %s2426_s26 = smov [#allocation8]  }
  0x6d   : > { %p2266_p1 = scmp.ne.s32.totalorder %s2666_s15, %s2265_s23  ;;  %s2269_s5 = sshll.u32 %s2426_s26, 4  ;;  %s2270_s5 = int_to_ptr.vmem [resolvable:$false] %s2269_s5 }
  0x6e   : > { %s2271_s6 = scalar_lea.vmem %s2270_s5, 1024  ;;  %p2272_p3 = scmp.lt.s32.totalorder %s2666_s15, %s2270_s5 }
  0x6f   : > { %p2267_p10 = pnand %p2266_p1, %p3319_p6  ;;  %p2273_p4 = scmp.lt.s32.totalorder %s2271_s6, %s2265_s23 }
  0x71   : > { %p2268_p13 = pneg %p2267_p10  ;;  %p2274_p9 = por %p2273_p4, %p2272_p3 }
  0x73   : > { %p2275_p12 = pnand %p2274_p9, %p2268_p13 }
  0x75   : > { %2278 = shalt.err (!%p2275_p12)
}
  0x76   : > { %s2427_s10 = smov 256   ;;  %s2428_s17 = smov 128  }
  0x77   : > { %s2429_s0 = smov 8  }
  0x78   : > { %1980 = dma.hbm_to_vmem [thread:$0]  (%p3319_p6), %s2664_s24, 512, %s2666_s15, %s2668_s18, %s2427_s10, %s2428_s17, %s2429_s0  }
  0x79 PF: > { %p3320_p11 = scmp.ne.s32.totalorder %s3316_s19, 0 }
  0x7a   : > { %s358_s7 = sand.u32 (!%p3320_p11), 1, %s2389_s30   ;;  %s364_s21 = sand.u32 (!%p3320_p11), 1, %s2381_s28  }
  0x7b   : > { %355 = sbr.rel (%p3320_p11) target bundleno = 1835 (0x72b), region = 82  ;;  %s1853_s22 = sshll.u32 (!%p3320_p11), %s358_s7, 5 }
  0x7c   : > { %s1854_s27 = sshll.u32 (!%p3320_p11), %s364_s21, 5  ;;  %s2698_s23 = scalar_lea.vmem (!%p3320_p11), [#allocation7], %s1853_s22 }
  0x7d   : > { %s365_s26 = scalar_lea.sflag (!%p3320_p11), [#allocation9], %s364_s21  ;;  %s2700_s5 = scalar_lea.vmem (!%p3320_p11), [#allocation8], %s1854_s27 }
  0x7e   : > { %p3321_p7 = scmp.ne.s32.totalorder (!%p3320_p11), %s3307_s16, 0 }
  0x82   : > { %2360 = dma.done.wait (%p3321_p7), %s365_s26, 512  }
  0x83   : > { %2362 = vsyncadd (%p3321_p7), %s365_s26, 4294966784  ;;  %p3322_p6 = scmp.ne.s32.totalorder %s3305_s20, 0 }
  0x85   : > { %2364 = dma.done.wait (%p3322_p6), [#allocation12], 256  }
  0x86   : > { %2366 = vsyncadd (%p3322_p6), [#allocation12], 4294967040  ;;  %s2710_s19 = scalar_lea.vmem [#allocation13], %s1853_s22  ;;  %p1857_p8 = scmp.ne.s32.totalorder %s2397_s9, 0 }
  0x87   : > { %v412_v4 = vld [vmem:[%s2698_s23] sm:$0xff] (!%p1857_p8)  ;;  %v413_v5 = vld [vmem:[%s2698_s23 + $0x8] sm:$0xff] (!%p1857_p8)  ;;  %v414_v6 = vld [vmem:[%s2698_s23 + $0x10] sm:$0xff] (!%p1857_p8)  ;;  %vm456_vm0 = vcmask (!%p1857_p8), 261120   ;;  %vm560_vm1 = vcmask (!%p1857_p8), 7168   ;;  %v2430_v9 = vmov (!%p1857_p8), 0.0  }
  0x88   : > { %411 = sbr.rel (%p1857_p8) target bundleno = 553 (0x229), region = 98  ;;  %v416_v7 = vpack.c.bf16 (!%p1857_p8), %v413_v5, %v412_v4  ;;  %v415_v8 = vld [vmem:[%s2698_s23 + $0x18] sm:$0xff] (!%p1857_p8)  ;;  %577 = vst.msk [vmem:[#allocation4] sm:$0xff] (!%p1857_p8), %vm560_vm1, %v2430_v9  ;;  %578 = vst.msk [vmem:[#allocation4 + $0x8] sm:$0xff] (!%p1857_p8), %vm560_vm1, %v2430_v9  ;;  %v2117_v11 = vld [vmem:[#allocation11] sm:$0xff] (!%p1857_p8)   ;;  %v2431_v12 = vmov (!%p1857_p8), -inf  }
  0x89   : > { %579 = vst.msk [vmem:[#allocation4 + $0x10] sm:$0xff] (!%p1857_p8), %vm560_vm1, %v2430_v9  ;;  %580 = vst.msk [vmem:[#allocation4 + $0x18] sm:$0xff] (!%p1857_p8), %vm560_vm1, %v2430_v9  ;;  %v417_v10 = vpack.c.bf16 (!%p1857_p8), %v415_v8, %v414_v6  ;;  %v2432_v13 = vmov (!%p1857_p8), 0   ;;  %v422_v14 = vld [vmem:[%s3275_s4] sm:$0xff] (!%p1857_p8)  ;;  %v424_v15 = vld [vmem:[%s3275_s4 + $0x10] sm:$0xff] (!%p1857_p8)  ;;  %1918 = vmatprep.mubr.msk.bf16.mxu0 (!%p1857_p8), %vm456_vm0, %v2117_v11 }
  0x8a   : > { %581 = vst.msk [vmem:[#allocation4 + $0x20] sm:$0xff] (!%p1857_p8), %vm560_vm1, %v2430_v9  ;;  %582 = vst.msk [vmem:[#allocation4 + $0x28] sm:$0xff] (!%p1857_p8), %vm560_vm1, %v2430_v9  ;;  %1914 = vmatprep.subr.bf16.mxu0 (!%p1857_p8), %v416_v7  ;;  %2115 = vset.pattern.permute.xlu0 (!%p1857_p8), %v2432_v13  ;;  %v2118_v16 = vld [vmem:[#allocation11 + $0x8] sm:$0xff] (!%p1857_p8)   ;;  %v425_v18 = vld [vmem:[%s3275_s4 + $0x18] sm:$0xff] (!%p1857_p8) }
  0x8b   : > { %583 = vst.msk [vmem:[#allocation4 + $0x30] sm:$0xff] (!%p1857_p8), %vm560_vm1, %v2430_v9  ;;  %584 = vst.msk [vmem:[#allocation4 + $0x38] sm:$0xff] (!%p1857_p8), %vm560_vm1, %v2430_v9  ;;  %1915 = vmatpush3.bf16.msra.mxu0 (!%p1857_p8), %v416_v7  ;;  %2116 = vset.pattern.permute.xlu1 (!%p1857_p8), %v2432_v13  ;;  %v423_v17 = vld [vmem:[%s3275_s4 + $0x8] sm:$0xff] (!%p1857_p8) }
  0x8c   : > { %585 = vst.msk [vmem:[#allocation4 + $0x40] sm:$0xff] (!%p1857_p8), %vm560_vm1, %v2430_v9  ;;  %586 = vst.msk [vmem:[#allocation4 + $0x48] sm:$0xff] (!%p1857_p8), %vm560_vm1, %v2430_v9  ;;  %1916 = vmatprep.subr.bf16.mxu0 (!%p1857_p8), %v417_v10  ;;  %428 = vperm.xlu0 (!%p1857_p8), %2115, %v422_v14  }
  0x8d   : > { %587 = vst.msk [vmem:[#allocation4 + $0x50] sm:$0xff] (!%p1857_p8), %vm560_vm1, %v2430_v9  ;;  %588 = vst.msk [vmem:[#allocation4 + $0x58] sm:$0xff] (!%p1857_p8), %vm560_vm1, %v2430_v9  ;;  %438 = vperm.xlu1 (!%p1857_p8), %2116, %v424_v15  }
  0x8e   : > { %589 = vst.msk [vmem:[#allocation4 + $0x60] sm:$0xff] (!%p1857_p8), %vm560_vm1, %v2430_v9  ;;  %590 = vst.msk [vmem:[#allocation4 + $0x68] sm:$0xff] (!%p1857_p8), %vm560_vm1, %v2430_v9 }
  0x8f   : > { %591 = vst.msk [vmem:[#allocation4 + $0x70] sm:$0xff] %vm560_vm1, %v2430_v9  ;;  %592 = vst.msk [vmem:[#allocation4 + $0x78] sm:$0xff] %vm560_vm1, %v2430_v9  ;;  %1917 = vmatpush3.bf16.msra.mxu0 %v417_v10 }
  0x90   : > { %593 = vst.msk [vmem:[#allocation5] sm:$0xff] %vm456_vm0, %v2430_v9  ;;  %594 = vst.msk [vmem:[#allocation5 + $0x8] sm:$0xff] %vm456_vm0, %v2430_v9  ;;  %433 = vperm.xlu0 %2115, %v423_v17  }
  0x91   : > { %595 = vst.msk [vmem:[#allocation5 + $0x10] sm:$0xff] %vm456_vm0, %v2430_v9  ;;  %596 = vst.msk [vmem:[#allocation5 + $0x18] sm:$0xff] %vm456_vm0, %v2430_v9  ;;  %443 = vperm.xlu1 %2116, %v425_v18  }
  0x92   : > { %597 = vst.msk [vmem:[#allocation5 + $0x20] sm:$0xff] %vm456_vm0, %v2430_v9  ;;  %598 = vst.msk [vmem:[#allocation5 + $0x28] sm:$0xff] %vm456_vm0, %v2430_v9  ;;  %1919 = vmatmul.mubr.msk.bf16.vlgmr.msra.gmra.mrb[0].mxu0 %vm456_vm0, %v2118_v16 }
  0x93   : > { %599 = vst.msk [vmem:[#allocation5 + $0x30] sm:$0xff] %vm456_vm0, %v2430_v9  ;;  %600 = vst.msk [vmem:[#allocation5 + $0x38] sm:$0xff] %vm456_vm0, %v2430_v9 }
  0x94   : > { %601 = vst.msk [vmem:[#allocation5 + $0x40] sm:$0xff] %vm456_vm0, %v2430_v9  ;;  %602 = vst.msk [vmem:[#allocation5 + $0x48] sm:$0xff] %vm456_vm0, %v2430_v9 }
  0x95   : > { %603 = vst.msk [vmem:[#allocation5 + $0x50] sm:$0xff] %vm456_vm0, %v2430_v9  ;;  %604 = vst.msk [vmem:[#allocation5 + $0x58] sm:$0xff] %vm456_vm0, %v2430_v9 }
  0x96   : > { %605 = vst.msk [vmem:[#allocation5 + $0x60] sm:$0xff] %vm456_vm0, %v2430_v9  ;;  %606 = vst.msk [vmem:[#allocation5 + $0x68] sm:$0xff] %vm456_vm0, %v2430_v9 }
  0x97   : > { %607 = vst.msk [vmem:[#allocation5 + $0x70] sm:$0xff] %vm456_vm0, %v2430_v9  ;;  %608 = vst.msk [vmem:[#allocation5 + $0x78] sm:$0xff] %vm456_vm0, %v2430_v9 }
  0x98   : > { %561 = vst.msk [vmem:[#allocation3] sm:$0xff] %vm560_vm1, %v2431_v12  ;;  %562 = vst.msk [vmem:[#allocation3 + $0x8] sm:$0xff] %vm560_vm1, %v2431_v12 }
  0x99   : > { %563 = vst.msk [vmem:[#allocation3 + $0x10] sm:$0xff] %vm560_vm1, %v2431_v12  ;;  %564 = vst.msk [vmem:[#allocation3 + $0x18] sm:$0xff] %vm560_vm1, %v2431_v12 }
  0x9a   : > { %565 = vst.msk [vmem:[#allocation3 + $0x20] sm:$0xff] %vm560_vm1, %v2431_v12  ;;  %566 = vst.msk [vmem:[#allocation3 + $0x28] sm:$0xff] %vm560_vm1, %v2431_v12 }
  0x9b   : > { %567 = vst.msk [vmem:[#allocation3 + $0x30] sm:$0xff] %vm560_vm1, %v2431_v12  ;;  %568 = vst.msk [vmem:[#allocation3 + $0x38] sm:$0xff] %vm560_vm1, %v2431_v12 }
  0x9c   : > { %569 = vst.msk [vmem:[#allocation3 + $0x40] sm:$0xff] %vm560_vm1, %v2431_v12  ;;  %570 = vst.msk [vmem:[#allocation3 + $0x48] sm:$0xff] %vm560_vm1, %v2431_v12 }
  0x9d   : > { %571 = vst.msk [vmem:[#allocation3 + $0x50] sm:$0xff] %vm560_vm1, %v2431_v12  ;;  %572 = vst.msk [vmem:[#allocation3 + $0x58] sm:$0xff] %vm560_vm1, %v2431_v12 }
  0x9e   : > { %573 = vst.msk [vmem:[#allocation3 + $0x60] sm:$0xff] %vm560_vm1, %v2431_v12  ;;  %574 = vst.msk [vmem:[#allocation3 + $0x68] sm:$0xff] %vm560_vm1, %v2431_v12 }
  0x9f   : > { %575 = vst.msk [vmem:[#allocation3 + $0x70] sm:$0xff] %vm560_vm1, %v2431_v12  ;;  %576 = vst.msk [vmem:[#allocation3 + $0x78] sm:$0xff] %vm560_vm1, %v2431_v12 }
 0x10b   : > { %v429_v19 = vpop.permute.xlu0 %428 }
 0x10c   : > { %v439_v25 = vpop.permute.xlu1 %438 }
 0x10f   : > { %v434_v26 = vpop.permute.xlu0 %433 }
 0x110   : > { %v444_v29 = vpop.permute.xlu1 %443 }
 0x165   : > { %v1920_v20 = vpop.f32.mrb[0].mxu0 }
 0x166   : > { %v497_v21 = vpop.f32.mrb[1].mxu0  ;;  %v506_v28 = vadd.f32 %v1920_v20, %v439_v25 }
 0x167   : > { %v498_v22 = vadd.f32 %v497_v21, %v429_v19  ;;  %v1921_v23 = vpop.f32.mrb[2].mxu0 }
 0x168   : > { %v500_v24 = vpop.f32.mrb[3].mxu0  ;;  %v509_v30 = vadd.f32 %v1921_v23, %v444_v29 }
 0x169   : > { %512 = vxpose.xlu0.b32.start [1/4] (short) %v498_v22, 128  ;;  %v501_v27 = vadd.f32 %v500_v24, %v434_v26 }
 0x16d   : > { %513 = vxpose.xlu0.b32.cont [2/4] (short) %v501_v27, 128 }
 0x171   : > { %514 = vxpose.xlu0.b32.cont [3/4] (short) %v506_v28, 128 }
 0x175   : > { %515 = vxpose.xlu0.b32.end [4/4] (short) %v509_v30, 128 }
 0x1e9   : > { %v528_v31 = vpop.trf.xlu0 }
 0x1ed   : > { %v529_v32 = vpop.trf.xlu0 }
 0x1ee   : > { %v544_v33 = vpack.c.bf16 %v529_v32, %v528_v31 }
 0x1f0   : > { %552 = vst.msk [vmem:[#allocation2] sm:$0xff] %vm456_vm0, %v544_v33 }
 0x1f1   : > { %v530_v34 = vpop.trf.xlu0 }
 0x1f5   : > { %v531_v35 = vpop.trf.xlu0 }
 0x1f6   : > { %v545_v36 = vpack.c.bf16 %v531_v35, %v530_v34 }
 0x1f8   : > { %553 = vst.msk [vmem:[#allocation2 + $0x8] sm:$0xff] %vm456_vm0, %v545_v36 }
 0x1f9   : > { %v532_v37 = vpop.trf.xlu0 }
 0x1fd   : > { %v533_v38 = vpop.trf.xlu0 }
 0x1fe   : > { %v546_v39 = vpack.c.bf16 %v533_v38, %v532_v37 }
 0x200   : > { %554 = vst.msk [vmem:[#allocation2 + $0x10] sm:$0xff] %vm456_vm0, %v546_v39 }
 0x201   : > { %v534_v40 = vpop.trf.xlu0 }
 0x205   : > { %v535_v41 = vpop.trf.xlu0 }
 0x206   : > { %v547_v42 = vpack.c.bf16 %v535_v41, %v534_v40 }
 0x208   : > { %555 = vst.msk [vmem:[#allocation2 + $0x18] sm:$0xff] %vm456_vm0, %v547_v42 }
 0x209   : > { %v536_v43 = vpop.trf.xlu0 }
 0x20d   : > { %v537_v44 = vpop.trf.xlu0 }
 0x20e   : > { %v548_v45 = vpack.c.bf16 %v537_v44, %v536_v43 }
 0x210   : > { %556 = vst.msk [vmem:[#allocation2 + $0x20] sm:$0xff] %vm456_vm0, %v548_v45 }
 0x211   : > { %v538_v46 = vpop.trf.xlu0 }
 0x215   : > { %v539_v47 = vpop.trf.xlu0 }
 0x216   : > { %v549_v48 = vpack.c.bf16 %v539_v47, %v538_v46 }
 0x218   : > { %557 = vst.msk [vmem:[#allocation2 + $0x28] sm:$0xff] %vm456_vm0, %v549_v48 }
 0x219   : > { %v540_v49 = vpop.trf.xlu0 }
 0x21d   : > { %v541_v50 = vpop.trf.xlu0 }
 0x21e   : > { %v550_v51 = vpack.c.bf16 %v541_v50, %v540_v49 }
 0x220   : > { %558 = vst.msk [vmem:[#allocation2 + $0x30] sm:$0xff] %vm456_vm0, %v550_v51 }
 0x221   : > { %v542_v52 = vpop.trf.xlu0 }
 0x225   : > { %v543_v53 = vpop.trf.xlu0 }
 0x226   : > { %v551_v54 = vpack.c.bf16 %v543_v53, %v542_v52 }
 0x228   : > { %559 = vst.msk [vmem:[#allocation2 + $0x38] sm:$0xff] %vm456_vm0, %v551_v54 }
 0x229 PF: > { %v609_v55 = vld [vmem:[%s2700_s5] sm:$0xff]  ;;  %v610_v56 = vld [vmem:[%s2700_s5 + $0x8] sm:$0xff]  ;;  %v611_v57 = vld [vmem:[%s2700_s5 + $0x10] sm:$0xff]  ;;  %vm691_vm2 = vcmask 261120   ;;  %v2433_v60 = vmov 0   ;;  %s3323_s21 = sld [smem:[#allocation27_spill]] }
 0x22a   : > { %v613_v58 = vpack.c.bf16 %v610_v56, %v609_v55  ;;  %v612_v59 = vld [vmem:[%s2700_s5 + $0x18] sm:$0xff]  ;;  %2119 = vset.pattern.permute.xlu0 %v2433_v60  ;;  %2120 = vset.pattern.permute.xlu1 %v2433_v60  ;;  %s3324_s26 = sld [smem:[#allocation28_spill]]  ;;  %v773_v4 = vld [vmem:[#allocation2] sm:$0xff]  ;;  %v774_v21 = vld [vmem:[#allocation2 + $0x8] sm:$0xff]  ;;  %vm1222_vm3 = vcmask 7168   ;;  %p1878_p0 = scmp.ne.s32.totalorder %s2397_s9, 1 }
 0x22b   : > { %v614_v61 = vpack.c.bf16 %v612_v59, %v611_v57  ;;  %1938 = vmatprep.mubr.msk.bf16.mxu1 %vm691_vm2, %v773_v4  ;;  %v775_v22 = vld [vmem:[#allocation2 + $0x10] sm:$0xff]  ;;  %v776_v23 = vld [vmem:[#allocation2 + $0x18] sm:$0xff]  ;;  %v777_v24 = vld [vmem:[#allocation2 + $0x20] sm:$0xff]  ;;  %s1652_s9 = sld [smem:[#allocation6]] (!%p1878_p0) }
 0x22c   : > { %1922 = vmatprep.subr.bf16.mxu0 %v613_v58  ;;  %v778_v25 = vld [vmem:[#allocation2 + $0x28] sm:$0xff]  ;;  %v779_v26 = vld [vmem:[#allocation2 + $0x30] sm:$0xff]  ;;  %v2900_v56 = vld [vmem:[#allocation3] sm:$0xff] }
 0x22d   : > { %1923 = vmatpush3.bf16.msra.mxu0 %v613_v58  ;;  %v2895_v52 = vld [vmem:[#allocation3 + $0x10] sm:$0xff]  ;;  %v903_v55 = vld [vmem:[#allocation3 + $0x8] sm:$0xff]  ;;  %v2918_v4 = vld [vmem:[#allocation3 + $0x38] sm:$0xff] }
 0x22e   : > { %1924 = vmatprep.subr.bf16.mxu0 %v614_v61 }
 0x22f   : > { %v2121_v62 = vld [vmem:[%s3323_s21] sm:$0xff]   ;;  %v2122_v2 = vld [vmem:[%s3323_s21 + $0x8] sm:$0xff]   ;;  %v2123_v5 = vld [vmem:[%s3323_s21 + $0x10] sm:$0xff]  }
 0x230   : > { %s3325_s16 = smov %s3324_s26  ;;  %v623_v63 = vld [vmem:[%s3324_s26] sm:$0xff]  ;;  %1926 = vmatprep.mubr.msk.bf16.mxu0 %vm691_vm2, %v2121_v62  ;;  %v2124_v6 = vld [vmem:[%s3323_s21 + $0x18] sm:$0xff]   ;;  %v2909_v62 = vld [vmem:[#allocation3 + $0x30] sm:$0xff] }
 0x231   : > { %v625_v0 = vld [vmem:[%s3325_s16 + $0x10] sm:$0xff]  ;;  %633 = vperm.xlu0 %2119, %v623_v63   ;;  %v624_v1 = vld [vmem:[%s3325_s16 + $0x8] sm:$0xff]  ;;  %v626_v3 = vld [vmem:[%s3325_s16 + $0x18] sm:$0xff]  ;;  %1925 = vmatpush3.bf16.msra.mxu0 %v614_v61 }
 0x232   : > { %643 = vperm.xlu1 %2120, %v625_v0   ;;  %v780_v27 = vld [vmem:[#allocation2 + $0x38] sm:$0xff]  ;;  %v627_v44 = vld [vmem:[%s3325_s16 + $0x20] sm:$0xff]  ;;  %v628_v49 = vld [vmem:[%s3325_s16 + $0x28] sm:$0xff] }
 0x233   : > { %v630_v46 = vld [vmem:[%s3325_s16 + $0x38] sm:$0xff]  ;;  %v629_v51 = vld [vmem:[%s3325_s16 + $0x30] sm:$0xff] }
 0x234   : > { %1927 = vmatmul.mubr.msk.bf16.vlgmr.msra.gmra.mrb[0].mxu0 %vm691_vm2, %v2122_v2  ;;  %v2907_v61 = vld [vmem:[#allocation3 + $0x18] sm:$0xff] }
 0x235   : > { %638 = vperm.xlu0 %2119, %v624_v1   ;;  %1930 = vmatprep.mubr.msk.bf16.mxu0 %vm691_vm2, %v2123_v5 }
 0x236   : > { %648 = vperm.xlu1 %2120, %v626_v3   ;;  %v906_v3 = vld [vmem:[#allocation3 + $0x20] sm:$0xff] }
 0x23c   : > { %1931 = vmatmul.mubr.msk.bf16.gmra.mrb[4].mxu0 %vm691_vm2, %v2124_v6 }
 0x2b0   : > { %v634_v8 = vpop.permute.xlu0 %633 }
 0x2b1   : > { %v644_v7 = vpop.permute.xlu1 %643 }
 0x2b4   : > { %v639_v13 = vpop.permute.xlu0 %638 }
 0x2b5   : > { %v649_v10 = vpop.permute.xlu1 %648 }
 0x307   : > { %v1928_v9 = vpop.f32.mrb[0].mxu0 }
 0x308   : > { %v738_v11 = vpop.f32.mrb[1].mxu0  ;;  %v747_v14 = vadd.f32 %v1928_v9, %v644_v7  ;;  %v2929_v9 = vld [vmem:[#allocation3 + $0x28] sm:$0xff] }
 0x309   : > { %v1929_v12 = vpop.f32.mrb[2].mxu0  ;;  %v739_v17 = vadd.f32 %v738_v11, %v634_v8 }
 0x30a   : > { %v750_v15 = vadd.f32 %v1929_v12, %v649_v10  ;;  %v741_v16 = vpop.f32.mrb[3].mxu0  ;;  %v2931_v10 = vld [vmem:[#allocation3 + $0x50] sm:$0xff] }
 0x30b   : > { %v742_v18 = vadd.f32 %v741_v16, %v639_v13  ;;  %v2942_v16 = vld [vmem:[#allocation3 + $0x58] sm:$0xff] }
 0x30c   : > { %v770_v19 = vpack.c.bf16 %v750_v15, %v747_v14  ;;  %v2940_v15 = vld [vmem:[#allocation3 + $0x40] sm:$0xff] }
 0x30d   : > { %v769_v20 = vpack.c.bf16 %v742_v18, %v739_v17 }
 0x30f   : > { %1934 = vmatprep.subr.bf16.mxu1 %v769_v20  ;;  %v2878_v45 = vpop.f32.mrb[4].mxu0 }
 0x310   : > { %1935 = vmatpush3.bf16.msra.mxu1 %v769_v20  ;;  %v2883_v47 = vpop.f32.mrb[5].mxu0 }
 0x311   : > { %1936 = vmatprep.subr.bf16.mxu1 %v770_v19  ;;  %v2885_v48 = vpop.f32.mrb[6].mxu0 }
 0x312   : > { %v2890_v50 = vpop.f32.mrb[7].mxu0 }
 0x314   : > { %1937 = vmatpush3.bf16.msra.mxu1 %v770_v19 }
 0x317   : > { %1939 = vmatmul.mubr.msk.bf16.vlgmr.msra.gmra.mrb[0].mxu1 %vm691_vm2, %v774_v21 }
 0x318   : > { %1942 = vmatprep.mubr.msk.bf16.mxu1 %vm691_vm2, %v775_v22  ;;  %v2952_v22 = vld [vmem:[#allocation3 + $0x48] sm:$0xff] }
 0x31f   : > { %1943 = vmatmul.mubr.msk.bf16.gmra.mrb[4].mxu1 %vm691_vm2, %v776_v23  ;;  %v2954_v23 = vld [vmem:[#allocation3 + $0x70] sm:$0xff] }
 0x320   : > { %1946 = vmatprep.mubr.msk.bf16.mxu1 %vm691_vm2, %v777_v24 }
 0x327   : > { %1947 = vmatmul.mubr.msk.bf16.gmra.mrb[8].mxu1 %vm691_vm2, %v778_v25 }
 0x328   : > { %1950 = vmatprep.mubr.msk.bf16.mxu1 %vm691_vm2, %v779_v26 }
 0x32f   : > { %1951 = vmatmul.mubr.msk.bf16.gmra.mrb[12].mxu1 %vm691_vm2, %v780_v27 }
 0x3ea   : > { %v2827_v28 = vpop.f32.mrb[0].mxu1 }
 0x3eb   : > { %922 = vmax.xlane.f32.xlu0 %v2827_v28  ;;  %v2830_v29 = vpop.f32.mrb[1].mxu1 }
 0x3ec   : > { %v2832_v30 = vpop.f32.mrb[2].mxu1 }
 0x3ed   : > { %v2834_v31 = vpop.f32.mrb[3].mxu1 }
 0x3ee   : > { %920 = vmax.xlane.f32.xlu1 %v2834_v31 }
 0x3ef   : > { %918 = vmax.xlane.f32.xlu0 %v2830_v29 }
 0x3f2   : > { %v2838_v32 = vpop.f32.mrb[4].mxu1 }
 0x3f3   : > { %924 = vmax.xlane.f32.xlu0 %v2832_v30  ;;  %930 = vmax.xlane.f32.xlu1 %v2838_v32  ;;  %v2842_v33 = vpop.f32.mrb[5].mxu1 }
 0x3f4   : > { %v2844_v34 = vpop.f32.mrb[6].mxu1 }
 0x3f5   : > { %v2846_v35 = vpop.f32.mrb[7].mxu1 }
 0x3f7   : > { %926 = vmax.xlane.f32.xlu1 %v2842_v33  ;;  %932 = vmax.xlane.f32.xlu0 %v2844_v34 }
 0x3fa   : > { %v2850_v36 = vpop.f32.mrb[8].mxu1 }
 0x3fb   : > { %928 = vmax.xlane.f32.xlu0 %v2846_v35  ;;  %938 = vmax.xlane.f32.xlu1 %v2850_v36  ;;  %v2854_v37 = vpop.f32.mrb[9].mxu1 }
 0x3fc   : > { %v2856_v38 = vpop.f32.mrb[10].mxu1 }
 0x3fd   : > { %v2858_v39 = vpop.f32.mrb[11].mxu1 }
 0x3ff   : > { %934 = vmax.xlane.f32.xlu1 %v2854_v37  ;;  %940 = vmax.xlane.f32.xlu0 %v2856_v38 }
 0x402   : > { %v2862_v40 = vpop.f32.mrb[12].mxu1 }
 0x403   : > { %936 = vmax.xlane.f32.xlu0 %v2858_v39  ;;  %946 = vmax.xlane.f32.xlu1 %v2862_v40  ;;  %v2866_v41 = vpop.f32.mrb[13].mxu1 }
 0x404   : > { %v2868_v42 = vpop.f32.mrb[14].mxu1 }
 0x405   : > { %v2870_v43 = vpop.f32.mrb[15].mxu1 }
 0x407   : > { %942 = vmax.xlane.f32.xlu1 %v2866_v41  ;;  %944 = vmax.xlane.f32.xlu0 %v2870_v43 }
 0x40b   : > { %948 = vmax.xlane.f32.xlu0 %v2868_v42 }
 0x418   : > { %653 = vperm.xlu1 %2120, %v627_v44  }
 0x41c   : > { %668 = vperm.xlu1 %2120, %v630_v46  }
 0x421   : > { %658 = vperm.xlu0 %2119, %v628_v49  }
 0x425   : > { %663 = vperm.xlu0 %2119, %v629_v51   ;;  %v914_v51 = vld [vmem:[#allocation3 + $0x60] sm:$0xff] }
 0x478   : > { %v923_v53 = vpop.xlane.xlu0 %922 }
 0x479   : > { %v2898_v54 = vmax.f32 %v2895_v52, %v923_v53  ;;  %v2967_v53 = vld [vmem:[#allocation3 + $0x68] sm:$0xff] }
 0x47b   : > { %1490 = vst.msk [vmem:[#allocation3 + $0x10] sm:$0xff] %vm1222_vm3, %v2898_v54  ;;  %v921_v57 = vpop.xlane.xlu1 %920  ;;  %1026 = vperm.xlu0 %2119, %v2898_v54  }
 0x47c   : > { %v951_v58 = vmax.f32 %v903_v55, %v921_v57  ;;  %v919_v59 = vpop.xlane.xlu0 %918 }
 0x47d   : > { %v950_v60 = vmax.f32 %v2900_v56, %v919_v59 }
 0x47e   : > { %1489 = vst.msk [vmem:[#allocation3 + $0x8] sm:$0xff] %vm1222_vm3, %v951_v58  ;;  %v967_v17 = vsub.f32 %v903_v55, %v951_v58  ;;  %v968_v55 = vsub.f32 %v2895_v52, %v2898_v54 }
 0x47f   : > { %1488 = vst.msk [vmem:[#allocation3] sm:$0xff] %vm1222_vm3, %v950_v60  ;;  %1016 = vperm.xlu1 %2120, %v950_v60   ;;  %v966_v24 = vsub.f32 %v2900_v56, %v950_v60 }
 0x480   : > { %v925_v63 = vpop.xlane.xlu0 %924  ;;  %v931_v0 = vpop.xlane.xlu1 %930  ;;  %v984_v25 = vmul.f32 1.442695, %v967_v17 }
 0x481   : > { %v2913_v1 = vmax.f32 %v2907_v61, %v925_v63  ;;  %v2916_v2 = vmax.f32 %v2909_v62, %v931_v0  ;;  %v982_v56 = vmul.f32 1.442695, %v966_v24  ;;  %v2983_v0 = vld [vmem:[#allocation3 + $0x78] sm:$0xff] }
 0x482   : > { %2125 = vpow2.f32 %v984_v25 }
 0x483   : > { %1491 = vst.msk [vmem:[#allocation3 + $0x18] sm:$0xff] %vm1222_vm3, %v2913_v1  ;;  %1494 = vst.msk [vmem:[#allocation3 + $0x30] sm:$0xff] %vm1222_vm3, %v2916_v2  ;;  %1031 = vperm.xlu1 %2120, %v2913_v1   ;;  %1046 = vperm.xlu0 %2119, %v2916_v2   ;;  %2127 = vpow2.f32 %v982_v56 }
 0x484   : > { %v927_v5 = vpop.xlane.xlu1 %926  ;;  %v933_v6 = vpop.xlane.xlu0 %932 }
 0x485   : > { %v954_v7 = vmax.f32 %v906_v3, %v927_v5  ;;  %v2927_v8 = vmax.f32 %v2918_v4, %v933_v6  ;;  %v969_v5 = vsub.f32 %v2907_v61, %v2913_v1 }
 0x487   : > { %1492 = vst.msk [vmem:[#allocation3 + $0x20] sm:$0xff] %vm1222_vm3, %v954_v7  ;;  %1495 = vst.msk [vmem:[#allocation3 + $0x38] sm:$0xff] %vm1222_vm3, %v2927_v8  ;;  %1021 = vperm.xlu1 %2120, %v951_v58   ;;  %1036 = vperm.xlu0 %2119, %v954_v7   ;;  %v970_v26 = vsub.f32 %v906_v3, %v954_v7  ;;  %v972_v58 = vsub.f32 %v2909_v62, %v2916_v2  ;;  %v986_v3 = vmul.f32 1.442695, %v968_v55 }
 0x488   : > { %v929_v11 = vpop.xlane.xlu0 %928  ;;  %v939_v12 = vpop.xlane.xlu1 %938 }
 0x489   : > { %v2937_v13 = vmax.f32 %v2929_v9, %v929_v11  ;;  %v960_v14 = vmax.f32 %v2931_v10, %v939_v12  ;;  %v990_v59 = vmul.f32 1.442695, %v970_v26  ;;  %v994_v62 = vmul.f32 1.442695, %v972_v58 }
 0x48a   : > { %v988_v11 = vmul.f32 1.442695, %v969_v5 }
 0x48b   : > { %1493 = vst.msk [vmem:[#allocation3 + $0x28] sm:$0xff] %vm1222_vm3, %v2937_v13  ;;  %1498 = vst.msk [vmem:[#allocation3 + $0x50] sm:$0xff] %vm1222_vm3, %v960_v14  ;;  %1051 = vperm.xlu1 %2120, %v2927_v8   ;;  %1066 = vperm.xlu0 %2119, %v960_v14   ;;  %2129 = vpow2.f32 %v990_v59  ;;  %v976_v2 = vsub.f32 %v2931_v10, %v960_v14  ;;  %v971_v61 = vsub.f32 %v2929_v9, %v2937_v13 }
 0x48c   : > { %v935_v18 = vpop.xlane.xlu1 %934  ;;  %v941_v19 = vpop.xlane.xlu0 %940  ;;  %2131 = vpow2.f32 %v986_v3  ;;  %v973_v9 = vsub.f32 %v2918_v4, %v2927_v8 }
 0x48d   : > { %v958_v20 = vmax.f32 %v2940_v15, %v935_v18  ;;  %v2950_v21 = vmax.f32 %v2942_v16, %v941_v19  ;;  %2133 = vpow2.f32 %v994_v62  ;;  %v1002_v10 = vmul.f32 1.442695, %v976_v2  ;;  %v3004_v17 = vpop.eup %2125 }
 0x48e   : > { %2135 = vpow2.f32 %v988_v11  ;;  %v3010_v25 = vpop.eup %2127 }
 0x48f   : > { %1496 = vst.msk [vmem:[#allocation3 + $0x40] sm:$0xff] %vm1222_vm3, %v958_v20  ;;  %1499 = vst.msk [vmem:[#allocation3 + $0x58] sm:$0xff] %vm1222_vm3, %v2950_v21  ;;  %1041 = vperm.xlu1 %2120, %v2937_v13   ;;  %1056 = vperm.xlu0 %2119, %v958_v20   ;;  %v974_v12 = vsub.f32 %v2940_v15, %v958_v20  ;;  %v992_v13 = vmul.f32 1.442695, %v971_v61  ;;  %2137 = vpow2.f32 %v1002_v10 }
 0x490   : > { %v937_v27 = vpop.xlane.xlu0 %936  ;;  %v947_v44 = vpop.xlane.xlu1 %946  ;;  %v977_v8 = vsub.f32 %v2942_v16, %v2950_v21 }
 0x491   : > { %v2962_v46 = vmax.f32 %v2952_v22, %v937_v27  ;;  %v2965_v49 = vmax.f32 %v2954_v23, %v947_v44  ;;  %v998_v18 = vmul.f32 1.442695, %v974_v12  ;;  %v996_v44 = vmul.f32 1.442695, %v973_v9 }
 0x492   : > { %2139 = vpow2.f32 %v992_v13  ;;  %v1004_v16 = vmul.f32 1.442695, %v977_v8 }
 0x493   : > { %1497 = vst.msk [vmem:[#allocation3 + $0x48] sm:$0xff] %vm1222_vm3, %v2962_v46  ;;  %v980_v57 = vsub.f32 %v2954_v23, %v2965_v49  ;;  %1502 = vst.msk [vmem:[#allocation3 + $0x70] sm:$0xff] %vm1222_vm3, %v2965_v49  ;;  %1071 = vperm.xlu1 %2120, %v2950_v21   ;;  %2141 = vpow2.f32 %v998_v18  ;;  %v975_v21 = vsub.f32 %v2952_v22, %v2962_v46 }
 0x494   : > { %v943_v60 = vpop.xlane.xlu1 %942  ;;  %v945_v63 = vpop.xlane.xlu0 %944  ;;  %2143 = vpow2.f32 %v996_v44 }
 0x495   : > { %v962_v52 = vmax.f32 %v914_v51, %v943_v60  ;;  %v2981_v54 = vmax.f32 %v2967_v53, %v945_v63  ;;  %v3014_v26 = vpop.eup %2129  ;;  %v1000_v60 = vmul.f32 1.442695, %v975_v21 }
 0x496   : > { %v3020_v56 = vpop.eup %2131 }
 0x497   : > { %1500 = vst.msk [vmem:[#allocation3 + $0x60] sm:$0xff] %vm1222_vm3, %v962_v52  ;;  %1501 = vst.msk [vmem:[#allocation3 + $0x68] sm:$0xff] %vm1222_vm3, %v2981_v54  ;;  %1061 = vperm.xlu1 %2120, %v2962_v46   ;;  %1076 = vperm.xlu0 %2119, %v962_v52   ;;  %v978_v19 = vsub.f32 %v914_v51, %v962_v52  ;;  %v3024_v58 = vpop.eup %2133  ;;  %v979_v63 = vsub.f32 %v2967_v53, %v2981_v54 }
 0x498   : > { %v949_v6 = vpop.xlane.xlu0 %948  ;;  %v654_v14 = vpop.permute.xlu1 %653 }
 0x499   : > { %v2993_v7 = vmax.f32 %v2983_v0, %v949_v6  ;;  %v755_v15 = vadd.f32 %v2883_v47, %v654_v14  ;;  %v1006_v51 = vmul.f32 1.442695, %v978_v19  ;;  %v1008_v22 = vmul.f32 1.442695, %v979_v63 }
 0x49b   : > { %v981_v1 = vsub.f32 %v2983_v0, %v2993_v7  ;;  %1503 = vst.msk [vmem:[#allocation3 + $0x78] sm:$0xff] %vm1222_vm3, %v2993_v7  ;;  %1086 = vperm.xlu0 %2119, %v2965_v49   ;;  %1081 = vperm.xlu1 %2120, %v2981_v54   ;;  %2145 = vpow2.f32 %v1006_v51 }
 0x49c   : > { %v669_v27 = vpop.permute.xlu1 %668  ;;  %2147 = vpow2.f32 %v1004_v16 }
 0x49d   : > { %v766_v47 = vadd.f32 %v2885_v48, %v669_v27  ;;  %v3030_v48 = vpop.eup %2135  ;;  %2149 = vpow2.f32 %v1000_v60 }
 0x49e   : > { %2151 = vpow2.f32 %v1008_v22 }
 0x49f   : > { %1262 = vperm.xlu0 %2119, %v3004_v17   ;;  %1091 = vperm.xlu1 %2120, %v2993_v7  }
 0x4a0   : > { %v659_v24 = vpop.permute.xlu0 %658 }
 0x4a1   : > { %v758_v20 = vadd.f32 %v2890_v50, %v659_v24 }
 0x4a3   : > { %v771_v4 = vpack.c.bf16 %v758_v20, %v755_v15  ;;  %1277 = vperm.xlu0 %2119, %v3014_v26   ;;  %1257 = vperm.xlu1 %2120, %v3010_v25  }
 0x4a4   : > { %v664_v55 = vpop.permute.xlu0 %663 }
 0x4a5   : > { %v763_v50 = vadd.f32 %v2878_v45, %v664_v55  ;;  %1954 = vmatprep.subr.bf16.mxu0 %v771_v4  ;;  %1974 = vmatprep.subr.bf16.mxu1 %v771_v4  ;;  %v3032_v45 = vpop.eup %2137 }
 0x4a6   : > { %1955 = vmatpush3.bf16.xpose.msra.mxu0 %v771_v4  ;;  %1976 = vmatpush3.bf16.xpose.msra.mxu1 %v771_v4  ;;  %v3038_v52 = vpop.eup %2139 }
 0x4a7   : > { %v772_v59 = vpack.c.bf16 %v766_v47, %v763_v50  ;;  %1287 = vperm.xlu0 %2119, %v3024_v58   ;;  %1267 = vperm.xlu1 %2120, %v3020_v56   ;;  %v3040_v3 = vpop.eup %2141 }
 0x4a8   : > { %v3044_v46 = vpop.eup %2143 }
 0x4a9   : > { %1956 = vmatprep.subr.bf16.mxu0 %v772_v59  ;;  %1975 = vmatprep.subr.bf16.mxu1 %v772_v59  ;;  %v3046_v5 = vpop.eup %2145 }
 0x4aa   : > { %v3050_v53 = vpop.eup %2147 }
 0x4ab   : > { %1307 = vperm.xlu0 %2119, %v3032_v45   ;;  %1272 = vperm.xlu1 %2120, %v3030_v48   ;;  %v3053_v54 = vpop.eup %2149 }
 0x4ac   : > { %v3056_v62 = vpop.eup %2151 }
 0x4ae   : > { %1957 = vmatpush3.bf16.xpose.msra.mxu0 %v772_v59  ;;  %1977 = vmatpush3.bf16.xpose.msra.mxu1 %v772_v59 }
 0x4af   : > { %1297 = vperm.xlu0 %2119, %v3040_v3   ;;  %1282 = vperm.xlu1 %2120, %v3038_v52  }
 0x4b3   : > { %1317 = vperm.xlu0 %2119, %v3046_v5   ;;  %1292 = vperm.xlu1 %2120, %v3044_v46  }
 0x4b7   : > { %1312 = vperm.xlu1 %2120, %v3050_v53  }
 0x4bb   : > { %1302 = vperm.xlu1 %2120, %v3053_v54  }
 0x4bf   : > { %1322 = vperm.xlu1 %2120, %v3056_v62  }
 0x4fa   : > { %v1027_v2 = vpop.permute.xlu0 %1026 }
 0x4fb   : > { %v1096_v6 = vsub.f32 %v2827_v28, %v1027_v2 }
 0x4fd   : > { %v1114_v11 = vmul.f32 1.442695, %v1096_v6 }
 0x4fe   : > { %v1017_v61 = vpop.permute.xlu1 %1016 }
 0x4ff   : > { %2153 = vpow2.f32 %v1114_v11  ;;  %v1094_v10 = vsub.f32 %v2830_v29, %v1017_v61 }
 0x501   : > { %v1110_v12 = vmul.f32 1.442695, %v1094_v10 }
 0x502   : > { %v1032_v14 = vpop.permute.xlu1 %1031  ;;  %v1047_v9 = vpop.permute.xlu0 %1046 }
 0x503   : > { %2155 = vpow2.f32 %v1110_v12  ;;  %v1097_v13 = vsub.f32 %v2832_v30, %v1032_v14  ;;  %v1100_v19 = vsub.f32 %v2838_v32, %v1047_v9 }
 0x505   : > { %v1116_v18 = vmul.f32 1.442695, %v1097_v13  ;;  %v1122_v44 = vmul.f32 1.442695, %v1100_v19 }
 0x506   : > { %v1022_v24 = vpop.permute.xlu1 %1021  ;;  %v1037_v15 = vpop.permute.xlu0 %1036 }
 0x507   : > { %2157 = vpow2.f32 %v1116_v18  ;;  %v1095_v20 = vsub.f32 %v2834_v31, %v1022_v24  ;;  %v1098_v4 = vsub.f32 %v2842_v33, %v1037_v15 }
 0x509   : > { %v2154_v28 = vpop.eup %2153  ;;  %v1112_v27 = vmul.f32 1.442695, %v1095_v20  ;;  %v1118_v32 = vmul.f32 1.442695, %v1098_v4 }
 0x50a   : > { %v1052_v29 = vpop.permute.xlu1 %1051  ;;  %1178 = vadd.xlane.f32.xlu0 %v2154_v28  ;;  %v1067_v8 = vpop.permute.xlu0 %1066 }
 0x50b   : > { %2159 = vpow2.f32 %v1112_v27  ;;  %v1101_v51 = vsub.f32 %v2844_v34, %v1052_v29  ;;  %v1104_v47 = vsub.f32 %v2850_v36, %v1067_v8 }
 0x50c   : > { %2161 = vpow2.f32 %v1122_v44 }
 0x50d   : > { %v2156_v30 = vpop.eup %2155  ;;  %v1124_v55 = vmul.f32 1.442695, %v1101_v51  ;;  %v1130_v21 = vmul.f32 1.442695, %v1104_v47 }
 0x50e   : > { %v1042_v50 = vpop.permute.xlu1 %1041  ;;  %1174 = vadd.xlane.f32.xlu0 %v2156_v30  ;;  %v1057_v59 = vpop.permute.xlu0 %1056 }
 0x50f   : > { %2163 = vpow2.f32 %v1124_v55  ;;  %v1099_v31 = vsub.f32 %v2846_v35, %v1042_v50  ;;  %v1102_v60 = vsub.f32 %v2854_v37, %v1057_v59 }
 0x510   : > { %2165 = vpow2.f32 %v1118_v32 }
 0x511   : > { %v2158_v16 = vpop.eup %2157  ;;  %v1120_v33 = vmul.f32 1.442695, %v1099_v31  ;;  %v1126_v6 = vmul.f32 1.442695, %v1102_v60 }
 0x512   : > { %v1072_v63 = vpop.permute.xlu1 %1071  ;;  %1180 = vadd.xlane.f32.xlu0 %v2158_v16  ;;  %v1352_v34 = vpack.c.bf16 %v2158_v16, %v2154_v28  ;;  %v1012_v16 = vmul.f32 1.442695, %v981_v1 }
 0x513   : > { %2167 = vpow2.f32 %v1120_v33  ;;  %v1105_v22 = vsub.f32 %v2856_v38, %v1072_v63  ;;  %v1010_v33 = vmul.f32 1.442695, %v980_v57 }
 0x514   : > { %2169 = vpow2.f32 %v1130_v21 }
 0x515   : > { %v2160_v2 = vpop.eup %2159  ;;  %v1132_v36 = vmul.f32 1.442695, %v1105_v22 }
 0x516   : > { %v1062_v11 = vpop.permute.xlu1 %1061  ;;  %1176 = vadd.xlane.f32.xlu1 %v2160_v2  ;;  %v1077_v35 = vpop.permute.xlu0 %1076  ;;  %v1351_v61 = vpack.c.bf16 %v2160_v2, %v2156_v30 }
 0x517   : > { %2171 = vpow2.f32 %v1132_v36  ;;  %v1103_v10 = vsub.f32 %v2858_v39, %v1062_v11  ;;  %v1106_v12 = vsub.f32 %v2866_v41, %v1077_v35  ;;  %v2162_v37 = vpop.eup %2161  ;;  %v1144_v11 = vld [vmem:[#allocation4 + $0x10] sm:$0xff] }
 0x518   : > { %1958 = vmatprep.mubr.bf16.mxu0 %v1351_v61  ;;  %2173 = vpow2.f32 %v1126_v6  ;;  %v1160_v35 = vmul.f32 %v3020_v56, %v1144_v11  ;;  %v1143_v56 = vld [vmem:[#allocation4 + $0x8] sm:$0xff] }
 0x519   : > { %v2164_v14 = vpop.eup %2163  ;;  %v1128_v9 = vmul.f32 1.442695, %v1103_v10  ;;  %1959 = vmatmul.mubr.bf16.vlgmr.msra.gmra.mrb[8].mxu0 %v1352_v34  ;;  %v1134_v38 = vmul.f32 1.442695, %v1106_v12  ;;  %v1142_v10 = vld [vmem:[#allocation4] sm:$0xff] }
 0x51a   : > { %v1082_v13 = vpop.permute.xlu1 %1081  ;;  %1188 = vadd.xlane.f32.xlu0 %v2164_v14  ;;  %1186 = vadd.xlane.f32.xlu1 %v2162_v37  ;;  %v1087_v18 = vpop.permute.xlu0 %1086  ;;  %v1354_v19 = vpack.c.bf16 %v2164_v14, %v2162_v37  ;;  %v1158_v14 = vmul.f32 %v3010_v25, %v1142_v10 }
 0x51b   : > { %2175 = vpow2.f32 %v1128_v9  ;;  %v1107_v24 = vsub.f32 %v2870_v43, %v1082_v13  ;;  %v1108_v15 = vsub.f32 %v2862_v40, %v1087_v18  ;;  %v2166_v39 = vpop.eup %2165 }
 0x51c   : > { %2177 = vpow2.f32 %v1134_v38  ;;  %v1145_v38 = vld [vmem:[#allocation4 + $0x18] sm:$0xff] }
 0x51d   : > { %v2168_v20 = vpop.eup %2167  ;;  %v1136_v41 = vmul.f32 1.442695, %v1107_v24  ;;  %v1138_v28 = vmul.f32 1.442695, %v1108_v15  ;;  %v1161_v18 = vmul.f32 %v3030_v48, %v1145_v38 }
 0x51e   : > { %v1092_v27 = vpop.permute.xlu1 %1091  ;;  %1184 = vadd.xlane.f32.xlu0 %v2168_v20  ;;  %1182 = vadd.xlane.f32.xlu1 %v2166_v39  ;;  %v1353_v44 = vpack.c.bf16 %v2168_v20, %v2166_v39  ;;  %v2170_v29 = vpop.eup %2169  ;;  %v1159_v39 = vmul.f32 %v3004_v17, %v1143_v56  ;;  %v1155_v56 = vld [vmem:[#allocation4 + $0x68] sm:$0xff] }
 0x51f   : > { %2179 = vpow2.f32 %v1136_v41  ;;  %v1109_v4 = vsub.f32 %v2868_v42, %v1092_v27  ;;  %v3087_v63 = vpop.permute.xlu0 %1262  ;;  %v1148_v41 = vld [vmem:[#allocation4 + $0x30] sm:$0xff] }
 0x520   : > { %2181 = vpow2.f32 %v1138_v28  ;;  %1962 = vmatprep.mubr.bf16.mxu0 %v1353_v44  ;;  %v1149_v28 = vld [vmem:[#allocation4 + $0x38] sm:$0xff]  ;;  %v1164_v27 = vmul.f32 %v3024_v58, %v1148_v41  ;;  %v1171_v41 = vmul.f32 %v3056_v62, %v1155_v56 }
 0x521   : > { %v2172_v8 = vpop.eup %2171  ;;  %v1140_v51 = vmul.f32 1.442695, %v1109_v4  ;;  %1963 = vmatmul.mubr.bf16.gmra.mrb[12].mxu0 %v1354_v19  ;;  %v1165_v44 = vmul.f32 %v3044_v46, %v1149_v28  ;;  %v1153_v58 = vld [vmem:[#allocation4 + $0x58] sm:$0xff] }
 0x522   : > { %1196 = vadd.xlane.f32.xlu0 %v2172_v8  ;;  %1194 = vadd.xlane.f32.xlu1 %v2170_v29  ;;  %v1356_v40 = vpack.c.bf16 %v2172_v8, %v2170_v29  ;;  %v2174_v43 = vpop.eup %2173  ;;  %v3089_v34 = vpop.permute.xlu1 %1257  ;;  %v1146_v29 = vld [vmem:[#allocation4 + $0x20] sm:$0xff]  ;;  %v1147_v8 = vld [vmem:[#allocation4 + $0x28] sm:$0xff] }
 0x523   : > { %2183 = vpow2.f32 %v1140_v51  ;;  %v3091_v0 = vpop.permute.xlu0 %1277  ;;  %v1162_v17 = vmul.f32 %v3014_v26, %v1146_v29  ;;  %v1151_v26 = vld [vmem:[#allocation4 + $0x48] sm:$0xff] }
 0x524   : > { %2185 = vpow2.f32 %v1012_v16  ;;  %v1150_v16 = vld [vmem:[#allocation4 + $0x40] sm:$0xff] }
 0x525   : > { %v2176_v30 = vpop.eup %2175  ;;  %2187 = vpow2.f32 %v1010_v33  ;;  %v1166_v11 = vmul.f32 %v3040_v3, %v1150_v16 }
 0x526   : > { %1192 = vadd.xlane.f32.xlu0 %v2176_v30  ;;  %1190 = vadd.xlane.f32.xlu1 %v2174_v43  ;;  %v1355_v55 = vpack.c.bf16 %v2176_v30, %v2174_v43  ;;  %v2178_v32 = vpop.eup %2177  ;;  %v3093_v7 = vpop.permute.xlu1 %1267  ;;  %v1163_v43 = vmul.f32 %v3038_v52, %v1147_v8 }
 0x527   : > { %v3095_v1 = vpop.permute.xlu0 %1287 }
 0x528   : > { %1966 = vmatprep.mubr.bf16.mxu0 %v1355_v55 }
 0x529   : > { %v2180_v47 = vpop.eup %2179  ;;  %1967 = vmatmul.mubr.bf16.gmra.mrb[16].mxu0 %v1356_v40 }
 0x52a   : > { %v2182_v42 = vpop.eup %2181  ;;  %v1357_v50 = vpack.c.bf16 %v2180_v47, %v2178_v32  ;;  %v3097_v23 = vpop.permute.xlu1 %1272 }
 0x52b   : > { %1202 = vadd.xlane.f32.xlu1 %v2182_v42  ;;  %v3099_v49 = vpop.permute.xlu0 %1307 }
 0x52c   : > { %1970 = vmatprep.mubr.bf16.mxu1 %v1357_v50  ;;  %v1169_v50 = vmul.f32 %v3050_v53, %v1153_v58  ;;  %v1244_v58 = vld [vmem:[#allocation5 + $0x28] sm:$0xff] }
 0x52d   : > { %v2184_v31 = vpop.eup %2183 }
 0x52e   : > { %1204 = vadd.xlane.f32.xlu0 %v2184_v31  ;;  %v1358_v59 = vpack.c.bf16 %v2184_v31, %v2182_v42  ;;  %v3081_v21 = vpop.eup %2185  ;;  %v3101_v57 = vpop.permute.xlu1 %1282 }
 0x52f   : > { %1198 = vadd.xlane.f32.xlu1 %v2178_v32  ;;  %v3084_v60 = vpop.eup %2187  ;;  %v3103_v22 = vpop.permute.xlu0 %1297  ;;  %v1152_v32 = vld [vmem:[#allocation4 + $0x50] sm:$0xff] }
 0x530   : > { %1971 = vmatmul.mubr.bf16.vlgmr.msra.gmra.mrb[16].mxu1 %v1358_v59  ;;  %v1168_v42 = vmul.f32 %v3032_v45, %v1152_v32 }
 0x532   : > { %1200 = vadd.xlane.f32.xlu0 %v2180_v47  ;;  %v3105_v2 = vpop.permute.xlu1 %1292 }
 0x533   : > { %v3107_v36 = vpop.permute.xlu0 %1317 }
 0x536   : > { %v3109_v6 = vpop.permute.xlu1 %1312 }
 0x53a   : > { %v3112_v37 = vpop.permute.xlu1 %1302 }
 0x53e   : > { %v3118_v19 = vpop.permute.xlu1 %1322 }
 0x540   : > { %1332 = vperm.xlu1 %2120, %v3081_v21  }
 0x548   : > { %1327 = vperm.xlu0 %2119, %v3084_v60  }
 0x597   : > { %v1179_v61 = vpop.xlane.xlu0 %1178 }
 0x598   : > { %v1208_v12 = vadd.f32 %v1179_v61, %v1160_v35  ;;  %v1167_v35 = vmul.f32 %v3053_v54, %v1151_v26 }
 0x59a   : > { %1225 = vst.msk [vmem:[#allocation4 + $0x10] sm:$0xff] %vm1222_vm3, %v1208_v12 }
 0x59b   : > { %v1175_v9 = vpop.xlane.xlu0 %1174 }
 0x59c   : > { %v1206_v13 = vadd.f32 %v1175_v9, %v1158_v14  ;;  %v1156_v14 = vld [vmem:[#allocation4 + $0x70] sm:$0xff]  ;;  %v1157_v9 = vld [vmem:[#allocation4 + $0x78] sm:$0xff] }
 0x59d   : > { %v1172_v53 = vmul.f32 %v3084_v60, %v1156_v14 }
 0x59e   : > { %1223 = vst.msk [vmem:[#allocation4] sm:$0xff] %vm1222_vm3, %v1206_v13  ;;  %v1154_v13 = vld [vmem:[#allocation4 + $0x60] sm:$0xff] }
 0x59f   : > { %v1181_v24 = vpop.xlane.xlu0 %1180  ;;  %v1170_v3 = vmul.f32 %v3046_v5, %v1154_v13 }
 0x5a0   : > { %v1209_v15 = vadd.f32 %v1181_v24, %v1161_v18  ;;  %v1173_v24 = vmul.f32 %v3081_v21, %v1157_v9  ;;  %v1241_v21 = vld [vmem:[#allocation5 + $0x10] sm:$0xff] }
 0x5a1   : > { %v1337_v5 = vmul.f32 %v3093_v7, %v1241_v21  ;;  %v1243_v7 = vld [vmem:[#allocation5 + $0x20] sm:$0xff] }
 0x5a2   : > { %1226 = vst.msk [vmem:[#allocation4 + $0x18] sm:$0xff] %vm1222_vm3, %v1209_v15 }
 0x5a3   : > { %v1177_v20 = vpop.xlane.xlu1 %1176 }
 0x5a4   : > { %v1207_v25 = vadd.f32 %v1177_v20, %v1159_v39 }
 0x5a6   : > { %1224 = vst.msk [vmem:[#allocation4 + $0x8] sm:$0xff] %vm1222_vm3, %v1207_v25  ;;  %v1239_v25 = vld [vmem:[#allocation5] sm:$0xff] }
 0x5a7   : > { %v1187_v48 = vpop.xlane.xlu1 %1186  ;;  %v1189_v4 = vpop.xlane.xlu0 %1188 }
 0x5a8   : > { %v1212_v51 = vadd.f32 %v1187_v48, %v1164_v27  ;;  %v1213_v40 = vadd.f32 %v1189_v4, %v1165_v44  ;;  %v1242_v27 = vld [vmem:[#allocation5 + $0x18] sm:$0xff]  ;;  %v1240_v44 = vld [vmem:[#allocation5 + $0x8] sm:$0xff]  ;;  %v1335_v48 = vmul.f32 %v3089_v34, %v1239_v25 }
 0x5a9   : > { %v1338_v29 = vmul.f32 %v3097_v23, %v1242_v27  ;;  %v1336_v62 = vmul.f32 %v3087_v63, %v1240_v44  ;;  %v1246_v34 = vld [vmem:[#allocation5 + $0x38] sm:$0xff]  ;;  %v1339_v63 = vmul.f32 %v3091_v0, %v1243_v7 }
 0x5aa   : > { %1229 = vst.msk [vmem:[#allocation4 + $0x30] sm:$0xff] %vm1222_vm3, %v1212_v51  ;;  %1230 = vst.msk [vmem:[#allocation4 + $0x38] sm:$0xff] %vm1222_vm3, %v1213_v40  ;;  %v1250_v0 = vld [vmem:[#allocation5 + $0x58] sm:$0xff] }
 0x5ab   : > { %v1183_v30 = vpop.xlane.xlu1 %1182  ;;  %v1185_v55 = vpop.xlane.xlu0 %1184 }
 0x5ac   : > { %v1210_v47 = vadd.f32 %v1183_v30, %v1162_v17  ;;  %v1211_v46 = vadd.f32 %v1185_v55, %v1163_v43  ;;  %v1245_v55 = vld [vmem:[#allocation5 + $0x30] sm:$0xff] }
 0x5ad   : > { %v1341_v23 = vmul.f32 %v3095_v1, %v1245_v55 }
 0x5ae   : > { %1227 = vst.msk [vmem:[#allocation4 + $0x20] sm:$0xff] %vm1222_vm3, %v1210_v47  ;;  %1228 = vst.msk [vmem:[#allocation4 + $0x28] sm:$0xff] %vm1222_vm3, %v1211_v46  ;;  %v1342_v46 = vmul.f32 %v3105_v2, %v1246_v34 }
 0x5af   : > { %v1195_v31 = vpop.xlane.xlu1 %1194  ;;  %v1197_v59 = vpop.xlane.xlu0 %1196 }
 0x5b0   : > { %v1216_v33 = vadd.f32 %v1195_v31, %v1168_v42  ;;  %v1217_v52 = vadd.f32 %v1197_v59, %v1169_v50  ;;  %v1340_v31 = vmul.f32 %v3101_v57, %v1244_v58 }
 0x5b2   : > { %1233 = vst.msk [vmem:[#allocation4 + $0x50] sm:$0xff] %vm1222_vm3, %v1216_v33  ;;  %1234 = vst.msk [vmem:[#allocation4 + $0x58] sm:$0xff] %vm1222_vm3, %v1217_v52  ;;  %v1249_v52 = vld [vmem:[#allocation5 + $0x50] sm:$0xff] }
 0x5b3   : > { %v1191_v61 = vpop.xlane.xlu1 %1190  ;;  %v1193_v10 = vpop.xlane.xlu0 %1192  ;;  %v1345_v2 = vmul.f32 %v3099_v49, %v1249_v52 }
 0x5b4   : > { %v1214_v12 = vadd.f32 %v1191_v61, %v1166_v11  ;;  %v1215_v45 = vadd.f32 %v1193_v10, %v1167_v35  ;;  %v1247_v11 = vld [vmem:[#allocation5 + $0x40] sm:$0xff]  ;;  %v1248_v35 = vld [vmem:[#allocation5 + $0x48] sm:$0xff]  ;;  %v1346_v10 = vmul.f32 %v3109_v6, %v1250_v0 }
 0x5b5   : > { %v1343_v57 = vmul.f32 %v3103_v22, %v1247_v11  ;;  %v1344_v14 = vmul.f32 %v3112_v37, %v1248_v35  ;;  %v1254_v22 = vld [vmem:[#allocation5 + $0x78] sm:$0xff]  ;;  %v1252_v6 = vld [vmem:[#allocation5 + $0x68] sm:$0xff] }
 0x5b6   : > { %1231 = vst.msk [vmem:[#allocation4 + $0x40] sm:$0xff] %vm1222_vm3, %v1214_v12  ;;  %1232 = vst.msk [vmem:[#allocation4 + $0x48] sm:$0xff] %vm1222_vm3, %v1215_v45 }
 0x5b8   : > { %v1203_v38 = vpop.xlane.xlu1 %1202 }
 0x5b9   : > { %v1220_v18 = vadd.f32 %v1203_v38, %v1172_v53  ;;  %v1253_v38 = vld [vmem:[#allocation5 + $0x70] sm:$0xff]  ;;  %v1535_v7 = vld [vmem:[#allocation4 + $0x58] sm:$0xff] (!%p1878_p0) }
 0x5bb   : > { %1237 = vst.msk [vmem:[#allocation4 + $0x70] sm:$0xff] %vm1222_vm3, %v1220_v18  ;;  %v1205_v54 = vpop.xlane.xlu0 %1204 }
 0x5bc   : > { %v1199_v15 = vpop.xlane.xlu1 %1198  ;;  %v1221_v39 = vadd.f32 %v1205_v54, %v1173_v24 }
 0x5bd   : > { %v1218_v20 = vadd.f32 %v1199_v15, %v1170_v3  ;;  %v1251_v3 = vld [vmem:[#allocation5 + $0x60] sm:$0xff] }
 0x5be   : > { %1238 = vst.msk [vmem:[#allocation4 + $0x78] sm:$0xff] %vm1222_vm3, %v1221_v39  ;;  %v1347_v37 = vmul.f32 %v3107_v36, %v1251_v3  ;;  %v1526_v36 = vld [vmem:[#allocation4 + $0x10] sm:$0xff] (!%p1878_p0)  ;;  %v1532_v55 = vld [vmem:[#allocation4 + $0x40] sm:$0xff] (!%p1878_p0) }
 0x5bf   : > { %1235 = vst.msk [vmem:[#allocation4 + $0x60] sm:$0xff] %vm1222_vm3, %v1218_v20  ;;  %v1201_v60 = vpop.xlane.xlu0 %1200  ;;  %2191 = vrcp.f32 (!%p1878_p0), %v1526_v36 }
 0x5c0   : > { %v1219_v28 = vadd.f32 %v1201_v60, %v1171_v41  ;;  %v1333_v54 = vpop.permute.xlu1 %1332  ;;  %v1348_v60 = vmul.f32 %v3118_v19, %v1252_v6  ;;  %v2434_v19 = vmov (!%p1878_p0), 0  }
 0x5c1   : > { %v1350_v39 = vmul.f32 %v1333_v54, %v1254_v22  ;;  %2190 = vset.pattern.permute.xlu1 (!%p1878_p0), %v2434_v19  ;;  %2189 = vset.pattern.permute.xlu0 (!%p1878_p0), %v2434_v19 }
 0x5c2   : > { %1236 = vst.msk [vmem:[#allocation4 + $0x68] sm:$0xff] %vm1222_vm3, %v1219_v28 }
 0x5c7   : > { %v1328_v13 = vpop.permute.xlu0 %1327 }
 0x5c8   : > { %v1349_v56 = vmul.f32 %v1328_v13, %v1253_v38 }
 0x5ec   : > { %v1960_v4 = vpop.f32.mrb[8].mxu0 }
 0x5ed   : > { %v1458_v8 = vadd.f32 %v1960_v4, %v1337_v5  ;;  %v1393_v51 = vpop.f32.mrb[9].mxu0  ;;  %v1524_v5 = vld [vmem:[#allocation4] sm:$0xff] (!%p1878_p0)  ;;  %v1525_v4 = vld [vmem:[#allocation4 + $0x8] sm:$0xff] (!%p1878_p0) }
 0x5ee   : > { %v1456_v40 = vadd.f32 %v1393_v51, %v1335_v48  ;;  %v1961_v17 = vpop.f32.mrb[10].mxu0  ;;  %v1527_v48 = vld [vmem:[#allocation4 + $0x18] sm:$0xff] (!%p1878_p0)  ;;  %2193 = vrcp.f32 (!%p1878_p0), %v1524_v5 }
 0x5ef   : > { %1474 = vst.msk [vmem:[#allocation5 + $0x10] sm:$0xff] %vm691_vm2, %v1458_v8  ;;  %v1459_v43 = vadd.f32 %v1961_v17, %v1338_v29  ;;  %v1396_v30 = vpop.f32.mrb[11].mxu0  ;;  %2195 = vrcp.f32 (!%p1878_p0), %v1527_v48  ;;  %v1529_v29 = vld [vmem:[#allocation4 + $0x28] sm:$0xff] (!%p1878_p0)  ;;  %v1528_v8 = vld [vmem:[#allocation4 + $0x20] sm:$0xff] (!%p1878_p0)  ;;  %v1531_v51 = vld [vmem:[#allocation4 + $0x38] sm:$0xff] (!%p1878_p0) }
 0x5f0   : > { %1472 = vst.msk [vmem:[#allocation5] sm:$0xff] %vm691_vm2, %v1456_v40  ;;  %v1457_v32 = vadd.f32 %v1396_v30, %v1336_v62  ;;  %2197 = vrcp.f32 (!%p1878_p0), %v1525_v4  ;;  %v1530_v62 = vld [vmem:[#allocation4 + $0x30] sm:$0xff] (!%p1878_p0)  ;;  %v2192_v40 = vpop.eup (!%p1878_p0), %2191 }
 0x5f1   : > { %1475 = vst.msk [vmem:[#allocation5 + $0x18] sm:$0xff] %vm691_vm2, %v1459_v43  ;;  %2199 = vrcp.f32 (!%p1878_p0), %v1529_v29  ;;  %1568 = vperm.xlu1 (!%p1878_p0), %2190, %v2192_v40   ;;  %v1533_v43 = vld [vmem:[#allocation4 + $0x48] sm:$0xff] (!%p1878_p0) }
 0x5f2   : > { %1473 = vst.msk [vmem:[#allocation5 + $0x8] sm:$0xff] %vm691_vm2, %v1457_v32  ;;  %2201 = vrcp.f32 (!%p1878_p0), %v1528_v8 }
 0x5f3   : > { %2203 = vrcp.f32 (!%p1878_p0), %v1531_v51 }
 0x5f4   : > { %v1964_v47 = vpop.f32.mrb[12].mxu0  ;;  %2205 = vrcp.f32 (!%p1878_p0), %v1530_v62 }
 0x5f5   : > { %v1462_v42 = vadd.f32 %v1964_v47, %v1341_v23  ;;  %v1409_v50 = vpop.f32.mrb[13].mxu0  ;;  %2207 = vrcp.f32 (!%p1878_p0), %v1533_v43  ;;  %v1534_v23 = vld [vmem:[#allocation4 + $0x50] sm:$0xff] (!%p1878_p0) }
 0x5f6   : > { %v1460_v59 = vadd.f32 %v1409_v50, %v1339_v63  ;;  %v1965_v16 = vpop.f32.mrb[14].mxu0  ;;  %2209 = vrcp.f32 (!%p1878_p0), %v1532_v55  ;;  %v1537_v63 = vld [vmem:[#allocation4 + $0x68] sm:$0xff] (!%p1878_p0)  ;;  %v1539_v50 = vld [vmem:[#allocation4 + $0x78] sm:$0xff] (!%p1878_p0) }
 0x5f7   : > { %1478 = vst.msk [vmem:[#allocation5 + $0x30] sm:$0xff] %vm691_vm2, %v1462_v42  ;;  %v1463_v26 = vadd.f32 %v1965_v16, %v1342_v46  ;;  %v1412_v33 = vpop.f32.mrb[15].mxu0  ;;  %2211 = vrcp.f32 (!%p1878_p0), %v1535_v7  ;;  %v1536_v46 = vld [vmem:[#allocation4 + $0x60] sm:$0xff] (!%p1878_p0) }
 0x5f8   : > { %1476 = vst.msk [vmem:[#allocation5 + $0x20] sm:$0xff] %vm691_vm2, %v1460_v59  ;;  %v1461_v1 = vadd.f32 %v1412_v33, %v1340_v31  ;;  %v2194_v17 = vpop.eup (!%p1878_p0), %2193  ;;  %2213 = vrcp.f32 (!%p1878_p0), %v1534_v23  ;;  %v1538_v59 = vld [vmem:[#allocation4 + $0x70] sm:$0xff] (!%p1878_p0)  ;;  %v1685_v23 = vstv (!%p1878_p0), %s1652_s9 }
 0x5f9   : > { %1479 = vst.msk [vmem:[#allocation5 + $0x38] sm:$0xff] %vm691_vm2, %v1463_v26  ;;  %v2196_v30 = vpop.eup (!%p1878_p0), %2195  ;;  %1558 = vperm.xlu0 (!%p1878_p0), %2189, %v2194_v17   ;;  %2215 = vrcp.f32 (!%p1878_p0), %v1537_v63 }
 0x5fa   : > { %1477 = vst.msk [vmem:[#allocation5 + $0x28] sm:$0xff] %vm691_vm2, %v1461_v1  ;;  %v2198_v32 = vpop.eup (!%p1878_p0), %2197  ;;  %1573 = vperm.xlu1 (!%p1878_p0), %2190, %v2196_v30   ;;  %2217 = vrcp.f32 (!%p1878_p0), %v1536_v46 }
 0x5fb   : > { %v2200_v34 = vpop.eup (!%p1878_p0), %2199  ;;  %2219 = vrcp.f32 (!%p1878_p0), %v1539_v50 }
 0x5fc   : > { %v1968_v61 = vpop.f32.mrb[16].mxu0  ;;  %v2202_v58 = vpop.eup (!%p1878_p0), %2201  ;;  %2221 = vrcp.f32 (!%p1878_p0), %v1538_v59 }
 0x5fd   : > { %v1466_v12 = vadd.f32 %v1968_v61, %v1345_v2  ;;  %v1425_v45 = vpop.f32.mrb[17].mxu0  ;;  %1563 = vperm.xlu0 (!%p1878_p0), %2189, %v2198_v32   ;;  %v2204_v47 = vpop.eup (!%p1878_p0), %2203  ;;  %v1508_v2 = vld [vmem:[#allocation5] sm:$0xff] (!%p1878_p0)  ;;  %v1509_v61 = vld [vmem:[#allocation5 + $0x8] sm:$0xff] (!%p1878_p0) }
 0x5fe   : > { %v1464_v53 = vadd.f32 %v1425_v45, %v1343_v57  ;;  %v1969_v9 = vpop.f32.mrb[18].mxu0  ;;  %1583 = vperm.xlu1 (!%p1878_p0), %2190, %v2200_v34   ;;  %v2206_v42 = vpop.eup (!%p1878_p0), %2205 }
 0x5ff   : > { %1482 = vst.msk [vmem:[#allocation5 + $0x50] sm:$0xff] %vm691_vm2, %v1466_v12  ;;  %v1467_v18 = vadd.f32 %v1969_v9, %v1346_v10  ;;  %v1428_v24 = vpop.f32.mrb[19].mxu0  ;;  %v2208_v31 = vpop.eup (!%p1878_p0), %2207  ;;  %v1510_v10 = vld [vmem:[#allocation5 + $0x10] sm:$0xff] (!%p1878_p0)  ;;  %v1511_v9 = vld [vmem:[#allocation5 + $0x18] sm:$0xff] (!%p1878_p0) }
 0x600   : > { %1480 = vst.msk [vmem:[#allocation5 + $0x40] sm:$0xff] %vm691_vm2, %v1464_v53  ;;  %v1465_v49 = vadd.f32 %v1428_v24, %v1344_v14  ;;  %v2210_v16 = vpop.eup (!%p1878_p0), %2209  ;;  %v1512_v24 = vld [vmem:[#allocation5 + $0x20] sm:$0xff] (!%p1878_p0) }
 0x601   : > { %1483 = vst.msk [vmem:[#allocation5 + $0x58] sm:$0xff] %vm691_vm2, %v1467_v18  ;;  %1578 = vperm.xlu0 (!%p1878_p0), %2189, %v2202_v58   ;;  %v2212_v26 = vpop.eup (!%p1878_p0), %2211  ;;  %v1513_v22 = vld [vmem:[#allocation5 + $0x28] sm:$0xff] (!%p1878_p0)  ;;  %v1690_v58 = vld [vmem:[%s2698_s23] sm:$0xff] (!%p1878_p0) }
 0x602   : > { %1481 = vst.msk [vmem:[#allocation5 + $0x48] sm:$0xff] %vm691_vm2, %v1465_v49  ;;  %1593 = vperm.xlu1 (!%p1878_p0), %2190, %v2204_v47   ;;  %v2214_v33 = vpop.eup (!%p1878_p0), %2213 }
 0x603   : > { %v1972_v15 = vpop.f32.mrb[16].mxu1  ;;  %1507 = sbr.rel (%p1878_p0) target bundleno = 1805 (0x70d), region = 102  ;;  %v2216_v52 = vpop.eup (!%p1878_p0), %2215 }
 0x604   : > { %v1470_v20 = vadd.f32 %v1972_v15, %v1349_v56  ;;  %v1441_v41 = vpop.f32.mrb[17].mxu1  ;;  %v2218_v1 = vpop.eup (!%p1878_p0), %2217  ;;  %v1514_v56 = vld [vmem:[#allocation5 + $0x30] sm:$0xff] (!%p1878_p0) }
 0x605   : > { %v1468_v28 = vadd.f32 %v1441_v41, %v1347_v37  ;;  %v1973_v21 = vpop.f32.mrb[18].mxu1  ;;  %1588 = vperm.xlu0 (!%p1878_p0), %2189, %v2206_v42   ;;  %v2220_v11 = vpop.eup (!%p1878_p0), %2219  ;;  %v1691_v42 = vld [vmem:[%s2698_s23 + $0x8] sm:$0xff] (!%p1878_p0) }
 0x606   : > { %1486 = vst.msk [vmem:[#allocation5 + $0x70] sm:$0xff] %vm691_vm2, %v1470_v20  ;;  %v1471_v25 = vadd.f32 %v1973_v21, %v1350_v39  ;;  %v1444_v27 = vpop.f32.mrb[19].mxu1  ;;  %1603 = vperm.xlu1 (!%p1878_p0), %2190, %v2208_v31   ;;  %v2222_v0 = vpop.eup (!%p1878_p0), %2221  ;;  %v1515_v39 = vld [vmem:[#allocation5 + $0x38] sm:$0xff] (!%p1878_p0)  ;;  %v1518_v36 = vld [vmem:[#allocation5 + $0x50] sm:$0xff] (!%p1878_p0) }
 0x607   : > { %1484 = vst.msk [vmem:[#allocation5 + $0x60] sm:$0xff] %vm691_vm2, %v1468_v28  ;;  %v1469_v44 = vadd.f32 %v1444_v27, %v1348_v60  ;;  %v1516_v60 = vld [vmem:[#allocation5 + $0x40] sm:$0xff] (!%p1878_p0) }
 0x608   : > { %1487 = vst.msk [vmem:[#allocation5 + $0x78] sm:$0xff] %vm691_vm2, %v1471_v25  ;;  %v1519_v19 = vld [vmem:[#allocation5 + $0x58] sm:$0xff] (!%p1878_p0) }
 0x609   : > { %1485 = vst.msk [vmem:[#allocation5 + $0x68] sm:$0xff] %vm691_vm2, %v1469_v44  ;;  %1598 = vperm.xlu0 (!%p1878_p0), %2189, %v2210_v16   ;;  %v1517_v25 = vld [vmem:[#allocation5 + $0x48] sm:$0xff] (!%p1878_p0)  ;;  %v1692_v16 = vld [vmem:[%s2698_s23 + $0x10] sm:$0xff] (!%p1878_p0) }
 0x60a   : > { %1613 = vperm.xlu1 %2190, %v2212_v26  }
 0x60d   : > { %1608 = vperm.xlu0 %2189, %v2214_v33   ;;  %v1522_v30 = vld [vmem:[#allocation5 + $0x70] sm:$0xff] }
 0x60e   : > { %1623 = vperm.xlu1 %2190, %v2216_v52   ;;  %v1520_v8 = vld [vmem:[#allocation5 + $0x60] sm:$0xff] }
 0x60f   : > { %v1523_v7 = vld [vmem:[#allocation5 + $0x78] sm:$0xff] }
 0x610   : > { %v1521_v40 = vld [vmem:[#allocation5 + $0x68] sm:$0xff] }
 0x611   : > { %1618 = vperm.xlu0 %2189, %v2218_v1   ;;  %v1693_v1 = vld [vmem:[%s2698_s23 + $0x18] sm:$0xff] }
 0x612   : > { %1633 = vperm.xlu1 %2190, %v2220_v11  }
 0x615   : > { %1628 = vperm.xlu0 %2189, %v2222_v0  }
 0x670   : > { %v1569_v14 = vpop.permute.xlu1 %1568 }
 0x671   : > { %v1638_v53 = vmul.f32 %v1569_v14, %v1510_v10 }
 0x678   : > { %v1559_v35 = vpop.permute.xlu0 %1558 }
 0x679   : > { %v1636_v57 = vmul.f32 %v1559_v35, %v1508_v2  ;;  %v1574_v38 = vpop.permute.xlu1 %1573 }
 0x67a   : > { %v1639_v13 = vmul.f32 %v1574_v38, %v1511_v9 }
 0x67b   : > { %1653 = vxpose.xlu0.b32.start [1/16] (narrow) %v1636_v57, 32 }
 0x67c   : > { %v1564_v12 = vpop.permute.xlu0 %1563 }
 0x67d   : > { %v1637_v45 = vmul.f32 %v1564_v12, %v1509_v61  ;;  %v1584_v49 = vpop.permute.xlu1 %1583 }
 0x67e   : > { %v1641_v54 = vmul.f32 %v1584_v49, %v1513_v22 }
 0x67f   : > { %1654 = vxpose.xlu0.b32.cont [2/16] (narrow) %v1637_v45, 32 }
 0x680   : > { %v1579_v18 = vpop.permute.xlu0 %1578 }
 0x681   : > { %v1640_v3 = vmul.f32 %v1579_v18, %v1512_v24  ;;  %v1594_v15 = vpop.permute.xlu1 %1593 }
 0x682   : > { %v1643_v20 = vmul.f32 %v1594_v15, %v1515_v39 }
 0x683   : > { %1655 = vxpose.xlu0.b32.cont [3/16] (narrow) %v1638_v53, 32 }
 0x684   : > { %v1589_v6 = vpop.permute.xlu0 %1588 }
 0x685   : > { %v1642_v37 = vmul.f32 %v1589_v6, %v1514_v56  ;;  %v1604_v21 = vpop.permute.xlu1 %1603 }
 0x686   : > { %v1645_v27 = vmul.f32 %v1604_v21, %v1517_v25 }
 0x687   : > { %1656 = vxpose.xlu0.b32.cont [4/16] (narrow) %v1639_v13, 32 }
 0x688   : > { %v1599_v41 = vpop.permute.xlu0 %1598 }
 0x689   : > { %v1644_v28 = vmul.f32 %v1599_v41, %v1516_v60  ;;  %v1614_v48 = vpop.permute.xlu1 %1613 }
 0x68a   : > { %v1647_v4 = vmul.f32 %v1614_v48, %v1519_v19 }
 0x68b   : > { %1657 = vxpose.xlu0.b32.cont [5/16] (narrow) %v1640_v3, 32 }
 0x68c   : > { %v1609_v44 = vpop.permute.xlu0 %1608 }
 0x68d   : > { %v1646_v5 = vmul.f32 %v1609_v44, %v1518_v36  ;;  %v1624_v62 = vpop.permute.xlu1 %1623 }
 0x68e   : > { %v1649_v17 = vmul.f32 %v1624_v62, %v1521_v40 }
 0x68f   : > { %1658 = vxpose.xlu0.b32.cont [6/16] (narrow) %v1641_v54, 32 }
 0x690   : > { %v1619_v29 = vpop.permute.xlu0 %1618 }
 0x691   : > { %v1648_v51 = vmul.f32 %v1619_v29, %v1520_v8  ;;  %v1634_v32 = vpop.permute.xlu1 %1633 }
 0x692   : > { %v1651_v34 = vmul.f32 %v1634_v32, %v1523_v7 }
 0x693   : > { %1659 = vxpose.xlu0.b32.cont [7/16] (narrow) %v1642_v37, 32 }
 0x694   : > { %v1629_v43 = vpop.permute.xlu0 %1628 }
 0x695   : > { %v1650_v55 = vmul.f32 %v1629_v43, %v1522_v30 }
 0x697   : > { %1660 = vxpose.xlu0.b32.cont [8/16] (narrow) %v1643_v20, 32 }
 0x69b   : > { %1661 = vxpose.xlu0.b32.cont [9/16] (narrow) %v1644_v28, 32 }
 0x69f   : > { %1662 = vxpose.xlu0.b32.cont [10/16] (narrow) %v1645_v27, 32 }
 0x6a3   : > { %1663 = vxpose.xlu0.b32.cont [11/16] (narrow) %v1646_v5, 32 }
 0x6a7   : > { %1664 = vxpose.xlu0.b32.cont [12/16] (narrow) %v1647_v4, 32 }
 0x6ab   : > { %1665 = vxpose.xlu0.b32.cont [13/16] (narrow) %v1648_v51, 32 }
 0x6af   : > { %1666 = vxpose.xlu0.b32.cont [14/16] (narrow) %v1649_v17, 32 }
 0x6b3   : > { %1667 = vxpose.xlu0.b32.cont [15/16] (narrow) %v1650_v55, 32 }
 0x6b7   : > { %1668 = vxpose.xlu0.b32.end [16/16] (narrow) %v1651_v34, 32 }
 0x6fb   : > { %v1669_v63 = vpop.trf.xlu0 }
 0x6fc   : > { %v1686_v47 = vmul.f32 %v1685_v23, %v1669_v63 }
 0x6fe   : > { %v1694_v46 = vadd.f32 %v1690_v58, %v1686_v47 }
 0x6ff   : > { %v1670_v50 = vpop.trf.xlu0 }
 0x700   : > { %1698 = vst [vmem:[%s2710_s19] sm:$0xff] %v1694_v46  ;;  %v1687_v31 = vmul.f32 %v1685_v23, %v1670_v50 }
 0x702   : > { %v1695_v59 = vadd.f32 %v1691_v42, %v1687_v31 }
 0x703   : > { %v1671_v26 = vpop.trf.xlu0 }
 0x704   : > { %1699 = vst [vmem:[%s2710_s19 + $0x8] sm:$0xff] %v1695_v59  ;;  %v1688_v33 = vmul.f32 %v1685_v23, %v1671_v26 }
 0x706   : > { %v1696_v52 = vadd.f32 %v1692_v16, %v1688_v33 }
 0x707   : > { %v1672_v11 = vpop.trf.xlu0 }
 0x708   : > { %1700 = vst [vmem:[%s2710_s19 + $0x10] sm:$0xff] %v1696_v52  ;;  %v1689_v0 = vmul.f32 %v1685_v23, %v1672_v11 }
 0x70a   : > { %v1697_v2 = vadd.f32 %v1693_v1, %v1689_v0 }
 0x70c   : > { %1701 = vst [vmem:[%s2710_s19 + $0x18] sm:$0xff] %v1697_v2 }
 0x70d PF: > { %s3326_s10 = sld [smem:[#allocation19_spill]]  ;;  %s3327_s17 = sld [smem:[#allocation18_spill]] }
 0x70e   : > { %s3328_s0 = sld [smem:[#allocation23_spill]]  ;;  %s1717_s26 = sshll.u32 %s2710_s19, 4  ;;  %s3189_s26 = int_to_ptr.vmem [resolvable:$true] %s1717_s26 }
 0x70f   : > { %s3329_s23 = sld [smem:[#allocation29_spill]]  ;;  %s3198_s24 = scalar_lea.sflag [#allocation10], %s358_s7 }
 0x710   : > { %s2279_s18 = scalar_lea.vmem %s3189_s26, 512  ;;  %s2435_s19 = smov [#allocation13]  }
 0x711   : > { %p2280_p2 = scmp.ne.s32.totalorder %s3189_s26, %s2279_s18  ;;  %s2283_s6 = sshll.u32 %s2435_s19, 4  ;;  %s2284_s6 = int_to_ptr.vmem [resolvable:$false] %s2283_s6 }
 0x712   : > { %s2285_s9 = scalar_lea.vmem %s2284_s6, 1024  ;;  %p2286_p13 = scmp.lt.s32.totalorder %s3189_s26, %s2284_s6 }
 0x713   : > { %s1880_s22 = sshll.u32 %s3326_s10, 3  ;;  %p2287_p3 = scmp.lt.s32.totalorder %s2285_s9, %s2279_s18 }
 0x714   : > { %s1714_s27 = sadd.s32 %s3327_s17, %s1880_s22  ;;  %p3330_p5 = scmp.ne.s32.totalorder %s3328_s0, 0 }
 0x715   : > { %s1881_s20 = sshll.u32 %s1714_s27, 7  ;;  %p2288_p4 = por %p2287_p3, %p2286_p13 }
 0x716   : > { %s3194_s15 = scalar_lea.hbm %s3329_s23, %s1881_s20  ;;  %p2281_p1 = pnand %p2280_p2, %p3330_p5 }
 0x718   : > { %p2282_p10 = pneg %p2281_p1 }
 0x71a   : > { %p2289_p9 = pnand %p2288_p4, %p2282_p10 }
 0x71c   : > { %2292 = shalt.err (!%p2289_p9)
}
 0x71d   : > { %s2293_s7 = scalar_lea.hbm %s3194_s15, 512  ;;  %s2297_s22 = scalar_lea.hbm %s3329_s23, 2048 }
 0x71e   : > { %p2294_p12 = scmp.ne.s32.totalorder %s3194_s15, %s2293_s7  ;;  %p2298_p6 = scmp.lt.u32.totalorder %s3194_s15, %s3329_s23 }
 0x71f   : > { %p2299_p8 = scmp.lt.u32.totalorder %s2297_s22, %s2293_s7  ;;  %p2301_p2 = scmp.lt.u32.totalorder %s2293_s7, %s3194_s15 }
 0x720   : > { %p2295_p11 = pnand %p2294_p12, %p3330_p5 }
 0x721   : > { %p2300_p0 = por %p2299_p8, %p2298_p6 }
 0x722   : > { %p2296_p7 = pneg %p2295_p11 }
 0x723   : > { %p2302_p1 = por %p2301_p2, %p2300_p0 }
 0x725   : > { %p2303_p10 = pnand %p2302_p1, %p2296_p7 }
 0x727   : > { %2306 = shalt.err (!%p2303_p10)
}
 0x728   : > { %s2436_s25 = smov 128   ;;  %s2437_s5 = smov 256  }
 0x729   : > { %s2438_s18 = smov 8  }
 0x72a   : > { %1984 = dma.vmem_to_hbm [thread:$0]  (%p3330_p5), %s3189_s26, 512, %s3194_s15, %s3198_s24, %s2436_s25, %s2437_s5, %s2438_s18  }
 0x72b PF: > { %s3331_s19 = sld [smem:[#allocation17_spill]]  ;;  %s3332_s6 = sld [smem:[#allocation26_spill]] }
 0x72c   : > { %p1996_p13 = scmp.ge.s32.totalorder %s2421_s14, 2 }
 0x731   : > { %s1732_s9 = sand.u32 1, %s3331_s19   ;;  %p3333_p3 = scmp.ne.s32.totalorder %s3332_s6, 0 }
 0x732   : > { %s1733_s7 = scalar_lea.sflag [#allocation10], %s1732_s9 }
 0x733   : > { %p1991_p4 = pnand %p1996_p13, %p3333_p3 }
 0x735   : > { %2368 = dma.done.wait (!%p1991_p4), %s1733_s7, 512  }
 0x736   : > { %2370 = vsyncadd (!%p1991_p4), %s1733_s7, 4294966784  ;;  %s25_s14 = sadd.s32 1, %s2421_s14   ;;  %s3335_s0 = sld [smem:[#allocation25_spill]] }
 0x737   : > { %p3227_p9 = scmp.ge.s32.totalorder %s25_s14, 10   ;;  %s3336_s15 = sld [smem:[#allocation24_spill]] }
 0x738   : > { %s3337_s24 = sld [smem:[#allocation20_spill]]  ;;  %s3338_s17 = sld [smem:[#allocation21_spill]] }
 0x739   : > { %s3339_s22 = sld [smem:[#allocation22_spill]]  ;;  %s3341_s26 = smov %s2389_s30 }
 0x73a   : > { %s3342_s27 = smov %s2381_s28  ;;  %s3343_s28 = smov %s2385_s29 }
 0x73b   : > { %s3345_s30 = smov %s2393_s8  ;;  %s3347_s9 = smov %s2409_s11 }
 0x73c   : > { %s3344_s29 = smov %s3335_s0  ;;  %s3348_s0 = smov %s2413_s12 }
 0x73d   : > { %s3346_s8 = smov %s3336_s15  ;;  %s3349_s10 = smov %s2417_s13 }
 0x73e   : > { %s3350_s11 = smov %s3337_s24  ;;  %s3351_s12 = smov %s3338_s17 }
 0x73f   : > { %s3352_s13 = smov %s3339_s22  ;;  %24 = sbr.rel (!%p3227_p9) target bundleno = 16 (0x10), region = 151 }
 0x746   :  { %1738 = vsyncpa [#allocation9], 1 }
 0x747   :  { %1740 = vsyncpa [#allocation9 + $0x1], 1 }
 0x748   :  { %1741 = vsyncpa [#allocation12], 1 }
 0x749   :  { %1742 = vsyncpa [#allocation10], 1 }
 0x74a   :  { %1744 = vsyncpa [#allocation10 + $0x1], 1 }

</bundles_post_ra>
